<compile_context>
chip_gen: v7x
topology: tpu7x:2x2x1
jax: 0.10.0
libtpu: 0.0.40
codegen_flags: <defaults>
</compile_context>

<pallas_src>
import functools

import jax
import jax.numpy as jnp
from jax import lax
from jax.experimental import pallas as pl
from jax.experimental.pallas import tpu as pltpu


def dynamixer_kernel(x_ref, wc_ref, bc_ref, wg_ref, bg_ref, wo_ref, bo_ref,
                     o_ref, *, seq_len, num_head, reduced_dim, block_b):
    L, H, R, Bt = seq_len, num_head, reduced_dim, block_b
    x2d = x_ref[...]                          # (Bt*L, C)  rows = (b, l)
    C = x2d.shape[-1]
    Ch = C // H

    # ---- compress, computed directly in transposed orientation ---------------
    # compT[h*R + r, b*L + l] = sum_c Wc[h*R+r, c] * x[b, l, c] + bc[h*R+r]
    # ("A @ B.T" pattern -> single MXU matmul, no explicit transpose op).
    compT = lax.dot_general(wc_ref[...], x2d, (((1,), (1,)), ((), ())),
                            preferred_element_type=jnp.float32)
    compT = compT + bc_ref[...]               # (H*R, Bt*L)

    # ---- gather (b, h) rows: comp_heads[(b*H + h), r*L + l] -------------------
    # Static row/lane slices + concat only (no in-kernel reshape/transpose).
    r_blocks = []
    for r in range(R):
        rows = [compT[h * R + r:h * R + r + 1, b * L:(b + 1) * L]
                for b in range(Bt) for h in range(H)]
        r_blocks.append(jnp.concatenate(rows, axis=0))         # (Bt*H, L)
    comp_heads = jnp.concatenate(r_blocks, axis=1)             # (Bt*H, R*L)

    # ---- generate: ONE MXU matmul for every (batch, head) pair ----------------
    # logits[(b, h), j*L + k]  (generate weight pre-permuted wrapper-side).
    logits = jnp.dot(comp_heads, wg_ref[...],
                     preferred_element_type=jnp.float32) + bg_ref[...]

    # ---- softmax numerator on the lane-dense flat layout ----------------------
    # Per-(b, h) row max is constant across k for every j -> valid stable shift,
    # and max/exp run over all L*L lanes at once instead of (L, L) tiles.
    m = jnp.max(logits, axis=-1, keepdims=True)                # (Bt*H, 1)
    e = jnp.exp(logits - m)                                    # (Bt*H, L*L)

    # ---- token mixing per (b, h), softmax normalization folded in afterwards --
    # TODO(synk): for large L, replace the static slice/concat tile assembly with
    # a single relayout and stream the O(L^3*R) generate weight from HBM
    # (memory_space=pl.ANY + make_async_copy) instead of keeping it VMEM-resident
    # (v7x: 64 MiB VMEM / TensorCore).
    out_rows = []
    for b in range(Bt):
        mixed_cols = []
        for h in range(H):
            bh = b * H + h
            # (L, L) tile in [j, k] layout: rows are lane slices of the flat row.
            tile = jnp.concatenate(
                [e[bh:bh + 1, j * L:(j + 1) * L] for j in range(L)], axis=0)
            den = jnp.sum(tile, axis=-1, keepdims=True)        # (L, 1)
            xh = x2d[b * L:(b + 1) * L, h * Ch:(h + 1) * Ch]   # (L, Ch) [k, c]
            mixed = jnp.dot(tile, xh, preferred_element_type=jnp.float32)
            # normalize after the matmul: L reciprocals on the EUP, not L*L divs
            mixed = mixed * pl.reciprocal(den, approx=True)    # (L, Ch) [j, c]
            mixed_cols.append(mixed)
        out_rows.append(jnp.concatenate(mixed_cols, axis=1))   # (L, C)
    mixed_all = jnp.concatenate(out_rows, axis=0)              # (Bt*L, C)

    # ---- fused out projection: one (Bt*L, C) @ (C, C) matmul ------------------
    out = jnp.dot(mixed_all, wo_ref[...],
                  preferred_element_type=jnp.float32) + bo_ref[...]
    o_ref[...] = out.astype(o_ref.dtype)


def dynamixer_op(x, params, *, num_head, reduced_dim, block_b=None):
    B, L, C = x.shape
    H, R = num_head, reduced_dim
    assert C % H == 0
    if block_b is None:
        block_b = min(B, 8)
    assert B % block_b == 0, "block_b must divide the batch size"
    Bt = block_b

    # Wrapper-side weight re-layout (free: folded into the weights once).
    wc = params["compress_w"]                                   # (H*R, C) torch layout
    bc = params["compress_b"].reshape(H * R, 1)
    # generate: torch (L*L, L*R)[k*L+j, l*R+r] -> (R*L, L*L)[r*L+l, j*L+k]
    wg = params["generate_w"].reshape(L, L, L, R).transpose(3, 2, 1, 0)
    wg = wg.reshape(R * L, L * L)
    bg = params["generate_b"].reshape(L, L).T.reshape(1, L * L)
    wo = params["out_w"].T                                      # (C, C)
    bo = params["out_b"].reshape(1, C)

    x2d = x.reshape(B * L, C)                                   # 2-D row slab

    kernel = functools.partial(dynamixer_kernel, seq_len=L, num_head=H,
                               reduced_dim=R, block_b=Bt)

    # Explicit VMEM budget: double-buffered blocks + slack, capped so the value
    # is valid on every TPU generation (v7x: 64 MiB physical per TensorCore).
    block_bytes = 4 * (2 * Bt * L * C + H * R * C + H * R
                       + R * L * L * L + L * L + C * C + C)
    vmem_bytes = int(min(max(4 * block_bytes, 16 * 1024 * 1024),
                         48 * 1024 * 1024))

    out2d = pl.pallas_call(
        kernel,
        out_shape=jax.ShapeDtypeStruct((B * L, C), x.dtype),
        grid_spec=pl.GridSpec(
            grid=(B // Bt,),
            in_specs=[
                pl.BlockSpec((Bt * L, C), lambda i: (i, 0)),     # x slab
                pl.BlockSpec((H * R, C), lambda i: (0, 0)),      # compress W
                pl.BlockSpec((H * R, 1), lambda i: (0, 0)),      # compress b
                pl.BlockSpec((R * L, L * L), lambda i: (0, 0)),  # generate W
                pl.BlockSpec((1, L * L), lambda i: (0, 0)),      # generate b
                pl.BlockSpec((C, C), lambda i: (0, 0)),          # out W
                pl.BlockSpec((1, C), lambda i: (0, 0)),          # out b
            ],
            out_specs=pl.BlockSpec((Bt * L, C), lambda i: (i, 0)),
        ),
        compiler_params=pltpu.CompilerParams(
            dimension_semantics=("parallel",),
            vmem_limit_bytes=vmem_bytes),
    )(x2d, wc, bc, wg, bg, wo, bo)
    return out2d.reshape(B, L, C)


def reference(x, params, *, num_head, reduced_dim):
    """Pure-JAX transcription of the PyTorch forward (for validation)."""
    B, L, C = x.shape
    H, R = num_head, reduced_dim
    w = x @ params["compress_w"].T + params["compress_b"]            # (B, L, H*R)
    w = w.reshape(B, L, H, R).transpose(0, 2, 1, 3).reshape(B, H, L * R)
    w = w @ params["generate_w"].T + params["generate_b"]            # (B, H, L*L)
    w = w.reshape(B, H, L, L)
    w = jax.nn.softmax(w, axis=-2)
    xh = x.reshape(B, L, H, C // H).transpose(0, 2, 3, 1)            # (B, H, Ch, L)
    y = jnp.matmul(xh, w)                                            # (B, H, Ch, L)
    y = y.transpose(0, 3, 1, 2).reshape(B, L, C)
    return y @ params["out_w"].T + params["out_b"]


if __name__ == "__main__":
    # Module hyper-params (dim must be divisible by num_head)
    dim, seq_len, num_head, reduced_dim = 32, 8, 4, 2
    B = 4            # two grid steps with block_b=2 -> exercises batched blocks

    key = jax.random.PRNGKey(0)
    ks = jax.random.split(key, 7)

    def linear_init(kw, kb, out_f, in_f):
        bound = 1.0 / (in_f ** 0.5)
        w = jax.random.uniform(kw, (out_f, in_f), jnp.float32, -bound, bound)
        b = jax.random.uniform(kb, (out_f,), jnp.float32, -bound, bound)
        return w, b

    out_w, out_b = linear_init(ks[0], ks[1], dim, dim)
    compress_w, compress_b = linear_init(ks[2], ks[3], num_head * reduced_dim, dim)
    generate_w, generate_b = linear_init(ks[4], ks[5], seq_len * seq_len,
                                         seq_len * reduced_dim)
    params = dict(out_w=out_w, out_b=out_b,
                  compress_w=compress_w, compress_b=compress_b,
                  generate_w=generate_w, generate_b=generate_b)

    x = jax.random.normal(ks[6], (B, seq_len, dim), jnp.float32)

    y = dynamixer_op(x, params, num_head=num_head, reduced_dim=reduced_dim,
                     block_b=2)
    y = jax.block_until_ready(y)

    y_ref = reference(x, params, num_head=num_head, reduced_dim=reduced_dim)
    max_err = float(jnp.max(jnp.abs(y - y_ref)))
    # tolerance accounts for the approx (EUP) reciprocal in the softmax norm
    assert jnp.allclose(y, y_ref, atol=2e-3, rtol=2e-3), max_err

    print("KERNEL_OK")
</pallas_src>

<mosaic_0001>
module attributes {stable_mosaic.version = 11 : i64} {
  func.func @dynamixer_kernel(%arg0: i32, %arg1: memref<16x32xf32, #tpu.memory_space<vmem>>, %arg2: memref<8x32xf32, #tpu.memory_space<vmem>>, %arg3: memref<8x1xf32, #tpu.memory_space<vmem>>, %arg4: memref<16x64xf32, #tpu.memory_space<vmem>>, %arg5: memref<1x64xf32, #tpu.memory_space<vmem>>, %arg6: memref<32x32xf32, #tpu.memory_space<vmem>>, %arg7: memref<1x32xf32, #tpu.memory_space<vmem>>, %arg8: memref<16x32xf32, #tpu.memory_space<vmem>>) attributes {dimension_semantics = [#tpu.dimension_semantics<parallel>], iteration_bounds = array<i64: 2>, scalar_prefetch = 0 : i64, scratch_operands = 0 : i64, tpu.core_type = #tpu.core_type<tc>, window_params = [{transform_indices = @transform_0, window_bounds = array<i64: 16, 32>}, {pipeline_mode = #tpu.pipeline_mode<synchronous>, transform_indices = @transform_1, window_bounds = array<i64: 8, 32>}, {pipeline_mode = #tpu.pipeline_mode<synchronous>, transform_indices = @transform_2, window_bounds = array<i64: 8, 1>}, {pipeline_mode = #tpu.pipeline_mode<synchronous>, transform_indices = @transform_3, window_bounds = array<i64: 16, 64>}, {pipeline_mode = #tpu.pipeline_mode<synchronous>, transform_indices = @transform_4, window_bounds = array<i64: 1, 64>}, {pipeline_mode = #tpu.pipeline_mode<synchronous>, transform_indices = @transform_5, window_bounds = array<i64: 32, 32>}, {pipeline_mode = #tpu.pipeline_mode<synchronous>, transform_indices = @transform_6, window_bounds = array<i64: 1, 32>}, {transform_indices = @transform_7, window_bounds = array<i64: 16, 32>}]} {
    %c0 = arith.constant 0 : index
    %c0_0 = arith.constant 0 : index
    %0 = vector.load %arg1[%c0, %c0_0] : memref<16x32xf32, #tpu.memory_space<vmem>>, vector<16x32xf32>
    %c0_1 = arith.constant 0 : index
    %c0_2 = arith.constant 0 : index
    %1 = vector.load %arg2[%c0_1, %c0_2] : memref<8x32xf32, #tpu.memory_space<vmem>>, vector<8x32xf32>
    %cst = arith.constant dense<0.000000e+00> : vector<8x16xf32>
    %2 = tpu.matmul %1, %0, %cst {dimension_numbers = #tpu.dot_dimension_numbers<[1], [1], [0], [0], [0, 0, 1, 0], [], []>} : vector<8x32xf32>, vector<16x32xf32>, vector<8x16xf32> -> vector<8x16xf32>
    %c0_3 = arith.constant 0 : index
    %c0_4 = arith.constant 0 : index
    %3 = vector.load %arg3[%c0_3, %c0_4] : memref<8x1xf32, #tpu.memory_space<vmem>>, vector<8x1xf32>
    %4 = vector.broadcast %3 : vector<8x1xf32> to vector<8x16xf32>
    %5 = arith.addf %2, %4 : vector<8x16xf32>
    %6 = vector.extract_strided_slice %5 {offsets = [0, 0], sizes = [1, 8], strides = [1, 1]} : vector<8x16xf32> to vector<1x8xf32>
    %7 = vector.extract_strided_slice %5 {offsets = [2, 0], sizes = [1, 8], strides = [1, 1]} : vector<8x16xf32> to vector<1x8xf32>
    %8 = vector.extract_strided_slice %5 {offsets = [4, 0], sizes = [1, 8], strides = [1, 1]} : vector<8x16xf32> to vector<1x8xf32>
    %9 = vector.extract_strided_slice %5 {offsets = [6, 0], sizes = [1, 8], strides = [1, 1]} : vector<8x16xf32> to vector<1x8xf32>
    %10 = vector.extract_strided_slice %5 {offsets = [0, 8], sizes = [1, 8], strides = [1, 1]} : vector<8x16xf32> to vector<1x8xf32>
    %11 = vector.extract_strided_slice %5 {offsets = [2, 8], sizes = [1, 8], strides = [1, 1]} : vector<8x16xf32> to vector<1x8xf32>
    %12 = vector.extract_strided_slice %5 {offsets = [4, 8], sizes = [1, 8], strides = [1, 1]} : vector<8x16xf32> to vector<1x8xf32>
    %13 = vector.extract_strided_slice %5 {offsets = [6, 8], sizes = [1, 8], strides = [1, 1]} : vector<8x16xf32> to vector<1x8xf32>
    %14 = tpu.concatenate %6, %7, %8, %9, %10, %11, %12, %13 in 0 : vector<1x8xf32>, vector<1x8xf32>, vector<1x8xf32>, vector<1x8xf32>, vector<1x8xf32>, vector<1x8xf32>, vector<1x8xf32>, vector<1x8xf32> -> vector<8x8xf32>
    %15 = vector.extract_strided_slice %5 {offsets = [1, 0], sizes = [1, 8], strides = [1, 1]} : vector<8x16xf32> to vector<1x8xf32>
    %16 = vector.extract_strided_slice %5 {offsets = [3, 0], sizes = [1, 8], strides = [1, 1]} : vector<8x16xf32> to vector<1x8xf32>
    %17 = vector.extract_strided_slice %5 {offsets = [5, 0], sizes = [1, 8], strides = [1, 1]} : vector<8x16xf32> to vector<1x8xf32>
    %18 = vector.extract_strided_slice %5 {offsets = [7, 0], sizes = [1, 8], strides = [1, 1]} : vector<8x16xf32> to vector<1x8xf32>
    %19 = vector.extract_strided_slice %5 {offsets = [1, 8], sizes = [1, 8], strides = [1, 1]} : vector<8x16xf32> to vector<1x8xf32>
    %20 = vector.extract_strided_slice %5 {offsets = [3, 8], sizes = [1, 8], strides = [1, 1]} : vector<8x16xf32> to vector<1x8xf32>
    %21 = vector.extract_strided_slice %5 {offsets = [5, 8], sizes = [1, 8], strides = [1, 1]} : vector<8x16xf32> to vector<1x8xf32>
    %22 = vector.extract_strided_slice %5 {offsets = [7, 8], sizes = [1, 8], strides = [1, 1]} : vector<8x16xf32> to vector<1x8xf32>
    %23 = tpu.concatenate %15, %16, %17, %18, %19, %20, %21, %22 in 0 : vector<1x8xf32>, vector<1x8xf32>, vector<1x8xf32>, vector<1x8xf32>, vector<1x8xf32>, vector<1x8xf32>, vector<1x8xf32>, vector<1x8xf32> -> vector<8x8xf32>
    %24 = tpu.concatenate %14, %23 in 1 : vector<8x8xf32>, vector<8x8xf32> -> vector<8x16xf32>
    %c0_5 = arith.constant 0 : index
    %c0_6 = arith.constant 0 : index
    %25 = vector.load %arg4[%c0_5, %c0_6] : memref<16x64xf32, #tpu.memory_space<vmem>>, vector<16x64xf32>
    %cst_7 = arith.constant dense<0.000000e+00> : vector<8x64xf32>
    %26 = tpu.matmul %24, %25, %cst_7 {dimension_numbers = #tpu.dot_dimension_numbers<[1], [0], [0], [1], [0, 0, 1, 1], [], []>} : vector<8x16xf32>, vector<16x64xf32>, vector<8x64xf32> -> vector<8x64xf32>
    %c0_8 = arith.constant 0 : index
    %c0_9 = arith.constant 0 : index
    %27 = vector.load %arg5[%c0_8, %c0_9] : memref<1x64xf32, #tpu.memory_space<vmem>>, vector<1x64xf32>
    %28 = vector.broadcast %27 : vector<1x64xf32> to vector<8x64xf32>
    %29 = arith.addf %26, %28 : vector<8x64xf32>
    %cst_10 = arith.constant dense<0xFF800000> : vector<8xf32>
    %30 = vector.multi_reduction <maximumf>, %29, %cst_10 [1] : vector<8x64xf32> to vector<8xf32>
    %31 = vector.shape_cast %30 : vector<8xf32> to vector<8x1xf32>
    %32 = vector.broadcast %31 : vector<8x1xf32> to vector<8x64xf32>
    %33 = arith.subf %29, %32 : vector<8x64xf32>
    %34 = math.exp %33 : vector<8x64xf32>
    %35 = vector.extract_strided_slice %34 {offsets = [0, 0], sizes = [1, 8], strides = [1, 1]} : vector<8x64xf32> to vector<1x8xf32>
    %36 = vector.extract_strided_slice %34 {offsets = [0, 8], sizes = [1, 8], strides = [1, 1]} : vector<8x64xf32> to vector<1x8xf32>
    %37 = vector.extract_strided_slice %34 {offsets = [0, 16], sizes = [1, 8], strides = [1, 1]} : vector<8x64xf32> to vector<1x8xf32>
    %38 = vector.extract_strided_slice %34 {offsets = [0, 24], sizes = [1, 8], strides = [1, 1]} : vector<8x64xf32> to vector<1x8xf32>
    %39 = vector.extract_strided_slice %34 {offsets = [0, 32], sizes = [1, 8], strides = [1, 1]} : vector<8x64xf32> to vector<1x8xf32>
    %40 = vector.extract_strided_slice %34 {offsets = [0, 40], sizes = [1, 8], strides = [1, 1]} : vector<8x64xf32> to vector<1x8xf32>
    %41 = vector.extract_strided_slice %34 {offsets = [0, 48], sizes = [1, 8], strides = [1, 1]} : vector<8x64xf32> to vector<1x8xf32>
    %42 = vector.extract_strided_slice %34 {offsets = [0, 56], sizes = [1, 8], strides = [1, 1]} : vector<8x64xf32> to vector<1x8xf32>
    %43 = tpu.concatenate %35, %36, %37, %38, %39, %40, %41, %42 in 0 : vector<1x8xf32>, vector<1x8xf32>, vector<1x8xf32>, vector<1x8xf32>, vector<1x8xf32>, vector<1x8xf32>, vector<1x8xf32>, vector<1x8xf32> -> vector<8x8xf32>
    %cst_11 = arith.constant dense<0.000000e+00> : vector<8xf32>
    %44 = vector.multi_reduction <add>, %43, %cst_11 [1] : vector<8x8xf32> to vector<8xf32>
    %45 = vector.shape_cast %44 : vector<8xf32> to vector<8x1xf32>
    %46 = vector.extract_strided_slice %0 {offsets = [0, 0], sizes = [8, 8], strides = [1, 1]} : vector<16x32xf32> to vector<8x8xf32>
    %cst_12 = arith.constant dense<0.000000e+00> : vector<8x8xf32>
    %47 = tpu.matmul %43, %46, %cst_12 {dimension_numbers = #tpu.dot_dimension_numbers<[1], [0], [0], [1], [0, 0, 1, 1], [], []>} : vector<8x8xf32>, vector<8x8xf32>, vector<8x8xf32> -> vector<8x8xf32>
    %48 = tpu.reciprocal %45 {approx = true} : vector<8x1xf32> -> vector<8x1xf32>
    %49 = vector.broadcast %48 : vector<8x1xf32> to vector<8x8xf32>
    %50 = arith.mulf %47, %49 : vector<8x8xf32>
    %51 = vector.extract_strided_slice %34 {offsets = [1, 0], sizes = [1, 8], strides = [1, 1]} : vector<8x64xf32> to vector<1x8xf32>
    %52 = vector.extract_strided_slice %34 {offsets = [1, 8], sizes = [1, 8], strides = [1, 1]} : vector<8x64xf32> to vector<1x8xf32>
    %53 = vector.extract_strided_slice %34 {offsets = [1, 16], sizes = [1, 8], strides = [1, 1]} : vector<8x64xf32> to vector<1x8xf32>
    %54 = vector.extract_strided_slice %34 {offsets = [1, 24], sizes = [1, 8], strides = [1, 1]} : vector<8x64xf32> to vector<1x8xf32>
    %55 = vector.extract_strided_slice %34 {offsets = [1, 32], sizes = [1, 8], strides = [1, 1]} : vector<8x64xf32> to vector<1x8xf32>
    %56 = vector.extract_strided_slice %34 {offsets = [1, 40], sizes = [1, 8], strides = [1, 1]} : vector<8x64xf32> to vector<1x8xf32>
    %57 = vector.extract_strided_slice %34 {offsets = [1, 48], sizes = [1, 8], strides = [1, 1]} : vector<8x64xf32> to vector<1x8xf32>
    %58 = vector.extract_strided_slice %34 {offsets = [1, 56], sizes = [1, 8], strides = [1, 1]} : vector<8x64xf32> to vector<1x8xf32>
    %59 = tpu.concatenate %51, %52, %53, %54, %55, %56, %57, %58 in 0 : vector<1x8xf32>, vector<1x8xf32>, vector<1x8xf32>, vector<1x8xf32>, vector<1x8xf32>, vector<1x8xf32>, vector<1x8xf32>, vector<1x8xf32> -> vector<8x8xf32>
    %cst_13 = arith.constant dense<0.000000e+00> : vector<8xf32>
    %60 = vector.multi_reduction <add>, %59, %cst_13 [1] : vector<8x8xf32> to vector<8xf32>
    %61 = vector.shape_cast %60 : vector<8xf32> to vector<8x1xf32>
    %62 = vector.extract_strided_slice %0 {offsets = [0, 8], sizes = [8, 8], strides = [1, 1]} : vector<16x32xf32> to vector<8x8xf32>
    %cst_14 = arith.constant dense<0.000000e+00> : vector<8x8xf32>
    %63 = tpu.matmul %59, %62, %cst_14 {dimension_numbers = #tpu.dot_dimension_numbers<[1], [0], [0], [1], [0, 0, 1, 1], [], []>} : vector<8x8xf32>, vector<8x8xf32>, vector<8x8xf32> -> vector<8x8xf32>
    %64 = tpu.reciprocal %61 {approx = true} : vector<8x1xf32> -> vector<8x1xf32>
    %65 = vector.broadcast %64 : vector<8x1xf32> to vector<8x8xf32>
    %66 = arith.mulf %63, %65 : vector<8x8xf32>
    %67 = vector.extract_strided_slice %34 {offsets = [2, 0], sizes = [1, 8], strides = [1, 1]} : vector<8x64xf32> to vector<1x8xf32>
    %68 = vector.extract_strided_slice %34 {offsets = [2, 8], sizes = [1, 8], strides = [1, 1]} : vector<8x64xf32> to vector<1x8xf32>
    %69 = vector.extract_strided_slice %34 {offsets = [2, 16], sizes = [1, 8], strides = [1, 1]} : vector<8x64xf32> to vector<1x8xf32>
    %70 = vector.extract_strided_slice %34 {offsets = [2, 24], sizes = [1, 8], strides = [1, 1]} : vector<8x64xf32> to vector<1x8xf32>
    %71 = vector.extract_strided_slice %34 {offsets = [2, 32], sizes = [1, 8], strides = [1, 1]} : vector<8x64xf32> to vector<1x8xf32>
    %72 = vector.extract_strided_slice %34 {offsets = [2, 40], sizes = [1, 8], strides = [1, 1]} : vector<8x64xf32> to vector<1x8xf32>
    %73 = vector.extract_strided_slice %34 {offsets = [2, 48], sizes = [1, 8], strides = [1, 1]} : vector<8x64xf32> to vector<1x8xf32>
    %74 = vector.extract_strided_slice %34 {offsets = [2, 56], sizes = [1, 8], strides = [1, 1]} : vector<8x64xf32> to vector<1x8xf32>
    %75 = tpu.concatenate %67, %68, %69, %70, %71, %72, %73, %74 in 0 : vector<1x8xf32>, vector<1x8xf32>, vector<1x8xf32>, vector<1x8xf32>, vector<1x8xf32>, vector<1x8xf32>, vector<1x8xf32>, vector<1x8xf32> -> vector<8x8xf32>
    %cst_15 = arith.constant dense<0.000000e+00> : vector<8xf32>
    %76 = vector.multi_reduction <add>, %75, %cst_15 [1] : vector<8x8xf32> to vector<8xf32>
    %77 = vector.shape_cast %76 : vector<8xf32> to vector<8x1xf32>
    %78 = vector.extract_strided_slice %0 {offsets = [0, 16], sizes = [8, 8], strides = [1, 1]} : vector<16x32xf32> to vector<8x8xf32>
    %cst_16 = arith.constant dense<0.000000e+00> : vector<8x8xf32>
    %79 = tpu.matmul %75, %78, %cst_16 {dimension_numbers = #tpu.dot_dimension_numbers<[1], [0], [0], [1], [0, 0, 1, 1], [], []>} : vector<8x8xf32>, vector<8x8xf32>, vector<8x8xf32> -> vector<8x8xf32>
    %80 = tpu.reciprocal %77 {approx = true} : vector<8x1xf32> -> vector<8x1xf32>
    %81 = vector.broadcast %80 : vector<8x1xf32> to vector<8x8xf32>
    %82 = arith.mulf %79, %81 : vector<8x8xf32>
    %83 = vector.extract_strided_slice %34 {offsets = [3, 0], sizes = [1, 8], strides = [1, 1]} : vector<8x64xf32> to vector<1x8xf32>
    %84 = vector.extract_strided_slice %34 {offsets = [3, 8], sizes = [1, 8], strides = [1, 1]} : vector<8x64xf32> to vector<1x8xf32>
    %85 = vector.extract_strided_slice %34 {offsets = [3, 16], sizes = [1, 8], strides = [1, 1]} : vector<8x64xf32> to vector<1x8xf32>
    %86 = vector.extract_strided_slice %34 {offsets = [3, 24], sizes = [1, 8], strides = [1, 1]} : vector<8x64xf32> to vector<1x8xf32>
    %87 = vector.extract_strided_slice %34 {offsets = [3, 32], sizes = [1, 8], strides = [1, 1]} : vector<8x64xf32> to vector<1x8xf32>
    %88 = vector.extract_strided_slice %34 {offsets = [3, 40], sizes = [1, 8], strides = [1, 1]} : vector<8x64xf32> to vector<1x8xf32>
    %89 = vector.extract_strided_slice %34 {offsets = [3, 48], sizes = [1, 8], strides = [1, 1]} : vector<8x64xf32> to vector<1x8xf32>
    %90 = vector.extract_strided_slice %34 {offsets = [3, 56], sizes = [1, 8], strides = [1, 1]} : vector<8x64xf32> to vector<1x8xf32>
    %91 = tpu.concatenate %83, %84, %85, %86, %87, %88, %89, %90 in 0 : vector<1x8xf32>, vector<1x8xf32>, vector<1x8xf32>, vector<1x8xf32>, vector<1x8xf32>, vector<1x8xf32>, vector<1x8xf32>, vector<1x8xf32> -> vector<8x8xf32>
    %cst_17 = arith.constant dense<0.000000e+00> : vector<8xf32>
    %92 = vector.multi_reduction <add>, %91, %cst_17 [1] : vector<8x8xf32> to vector<8xf32>
    %93 = vector.shape_cast %92 : vector<8xf32> to vector<8x1xf32>
    %94 = vector.extract_strided_slice %0 {offsets = [0, 24], sizes = [8, 8], strides = [1, 1]} : vector<16x32xf32> to vector<8x8xf32>
    %cst_18 = arith.constant dense<0.000000e+00> : vector<8x8xf32>
    %95 = tpu.matmul %91, %94, %cst_18 {dimension_numbers = #tpu.dot_dimension_numbers<[1], [0], [0], [1], [0, 0, 1, 1], [], []>} : vector<8x8xf32>, vector<8x8xf32>, vector<8x8xf32> -> vector<8x8xf32>
    %96 = tpu.reciprocal %93 {approx = true} : vector<8x1xf32> -> vector<8x1xf32>
    %97 = vector.broadcast %96 : vector<8x1xf32> to vector<8x8xf32>
    %98 = arith.mulf %95, %97 : vector<8x8xf32>
    %99 = tpu.concatenate %50, %66, %82, %98 in 1 : vector<8x8xf32>, vector<8x8xf32>, vector<8x8xf32>, vector<8x8xf32> -> vector<8x32xf32>
    %100 = vector.extract_strided_slice %34 {offsets = [4, 0], sizes = [1, 8], strides = [1, 1]} : vector<8x64xf32> to vector<1x8xf32>
    %101 = vector.extract_strided_slice %34 {offsets = [4, 8], sizes = [1, 8], strides = [1, 1]} : vector<8x64xf32> to vector<1x8xf32>
    %102 = vector.extract_strided_slice %34 {offsets = [4, 16], sizes = [1, 8], strides = [1, 1]} : vector<8x64xf32> to vector<1x8xf32>
    %103 = vector.extract_strided_slice %34 {offsets = [4, 24], sizes = [1, 8], strides = [1, 1]} : vector<8x64xf32> to vector<1x8xf32>
    %104 = vector.extract_strided_slice %34 {offsets = [4, 32], sizes = [1, 8], strides = [1, 1]} : vector<8x64xf32> to vector<1x8xf32>
    %105 = vector.extract_strided_slice %34 {offsets = [4, 40], sizes = [1, 8], strides = [1, 1]} : vector<8x64xf32> to vector<1x8xf32>
    %106 = vector.extract_strided_slice %34 {offsets = [4, 48], sizes = [1, 8], strides = [1, 1]} : vector<8x64xf32> to vector<1x8xf32>
    %107 = vector.extract_strided_slice %34 {offsets = [4, 56], sizes = [1, 8], strides = [1, 1]} : vector<8x64xf32> to vector<1x8xf32>
    %108 = tpu.concatenate %100, %101, %102, %103, %104, %105, %106, %107 in 0 : vector<1x8xf32>, vector<1x8xf32>, vector<1x8xf32>, vector<1x8xf32>, vector<1x8xf32>, vector<1x8xf32>, vector<1x8xf32>, vector<1x8xf32> -> vector<8x8xf32>
    %cst_19 = arith.constant dense<0.000000e+00> : vector<8xf32>
    %109 = vector.multi_reduction <add>, %108, %cst_19 [1] : vector<8x8xf32> to vector<8xf32>
    %110 = vector.shape_cast %109 : vector<8xf32> to vector<8x1xf32>
    %111 = vector.extract_strided_slice %0 {offsets = [8, 0], sizes = [8, 8], strides = [1, 1]} : vector<16x32xf32> to vector<8x8xf32>
    %cst_20 = arith.constant dense<0.000000e+00> : vector<8x8xf32>
    %112 = tpu.matmul %108, %111, %cst_20 {dimension_numbers = #tpu.dot_dimension_numbers<[1], [0], [0], [1], [0, 0, 1, 1], [], []>} : vector<8x8xf32>, vector<8x8xf32>, vector<8x8xf32> -> vector<8x8xf32>
    %113 = tpu.reciprocal %110 {approx = true} : vector<8x1xf32> -> vector<8x1xf32>
    %114 = vector.broadcast %113 : vector<8x1xf32> to vector<8x8xf32>
    %115 = arith.mulf %112, %114 : vector<8x8xf32>
    %116 = vector.extract_strided_slice %34 {offsets = [5, 0], sizes = [1, 8], strides = [1, 1]} : vector<8x64xf32> to vector<1x8xf32>
    %117 = vector.extract_strided_slice %34 {offsets = [5, 8], sizes = [1, 8], strides = [1, 1]} : vector<8x64xf32> to vector<1x8xf32>
    %118 = vector.extract_strided_slice %34 {offsets = [5, 16], sizes = [1, 8], strides = [1, 1]} : vector<8x64xf32> to vector<1x8xf32>
    %119 = vector.extract_strided_slice %34 {offsets = [5, 24], sizes = [1, 8], strides = [1, 1]} : vector<8x64xf32> to vector<1x8xf32>
    %120 = vector.extract_strided_slice %34 {offsets = [5, 32], sizes = [1, 8], strides = [1, 1]} : vector<8x64xf32> to vector<1x8xf32>
    %121 = vector.extract_strided_slice %34 {offsets = [5, 40], sizes = [1, 8], strides = [1, 1]} : vector<8x64xf32> to vector<1x8xf32>
    %122 = vector.extract_strided_slice %34 {offsets = [5, 48], sizes = [1, 8], strides = [1, 1]} : vector<8x64xf32> to vector<1x8xf32>
    %123 = vector.extract_strided_slice %34 {offsets = [5, 56], sizes = [1, 8], strides = [1, 1]} : vector<8x64xf32> to vector<1x8xf32>
    %124 = tpu.concatenate %116, %117, %118, %119, %120, %121, %122, %123 in 0 : vector<1x8xf32>, vector<1x8xf32>, vector<1x8xf32>, vector<1x8xf32>, vector<1x8xf32>, vector<1x8xf32>, vector<1x8xf32>, vector<1x8xf32> -> vector<8x8xf32>
    %cst_21 = arith.constant dense<0.000000e+00> : vector<8xf32>
    %125 = vector.multi_reduction <add>, %124, %cst_21 [1] : vector<8x8xf32> to vector<8xf32>
    %126 = vector.shape_cast %125 : vector<8xf32> to vector<8x1xf32>
    %127 = vector.extract_strided_slice %0 {offsets = [8, 8], sizes = [8, 8], strides = [1, 1]} : vector<16x32xf32> to vector<8x8xf32>
    %cst_22 = arith.constant dense<0.000000e+00> : vector<8x8xf32>
    %128 = tpu.matmul %124, %127, %cst_22 {dimension_numbers = #tpu.dot_dimension_numbers<[1], [0], [0], [1], [0, 0, 1, 1], [], []>} : vector<8x8xf32>, vector<8x8xf32>, vector<8x8xf32> -> vector<8x8xf32>
    %129 = tpu.reciprocal %126 {approx = true} : vector<8x1xf32> -> vector<8x1xf32>
    %130 = vector.broadcast %129 : vector<8x1xf32> to vector<8x8xf32>
    %131 = arith.mulf %128, %130 : vector<8x8xf32>
    %132 = vector.extract_strided_slice %34 {offsets = [6, 0], sizes = [1, 8], strides = [1, 1]} : vector<8x64xf32> to vector<1x8xf32>
    %133 = vector.extract_strided_slice %34 {offsets = [6, 8], sizes = [1, 8], strides = [1, 1]} : vector<8x64xf32> to vector<1x8xf32>
    %134 = vector.extract_strided_slice %34 {offsets = [6, 16], sizes = [1, 8], strides = [1, 1]} : vector<8x64xf32> to vector<1x8xf32>
    %135 = vector.extract_strided_slice %34 {offsets = [6, 24], sizes = [1, 8], strides = [1, 1]} : vector<8x64xf32> to vector<1x8xf32>
    %136 = vector.extract_strided_slice %34 {offsets = [6, 32], sizes = [1, 8], strides = [1, 1]} : vector<8x64xf32> to vector<1x8xf32>
    %137 = vector.extract_strided_slice %34 {offsets = [6, 40], sizes = [1, 8], strides = [1, 1]} : vector<8x64xf32> to vector<1x8xf32>
    %138 = vector.extract_strided_slice %34 {offsets = [6, 48], sizes = [1, 8], strides = [1, 1]} : vector<8x64xf32> to vector<1x8xf32>
    %139 = vector.extract_strided_slice %34 {offsets = [6, 56], sizes = [1, 8], strides = [1, 1]} : vector<8x64xf32> to vector<1x8xf32>
    %140 = tpu.concatenate %132, %133, %134, %135, %136, %137, %138, %139 in 0 : vector<1x8xf32>, vector<1x8xf32>, vector<1x8xf32>, vector<1x8xf32>, vector<1x8xf32>, vector<1x8xf32>, vector<1x8xf32>, vector<1x8xf32> -> vector<8x8xf32>
    %cst_23 = arith.constant dense<0.000000e+00> : vector<8xf32>
    %141 = vector.multi_reduction <add>, %140, %cst_23 [1] : vector<8x8xf32> to vector<8xf32>
    %142 = vector.shape_cast %141 : vector<8xf32> to vector<8x1xf32>
    %143 = vector.extract_strided_slice %0 {offsets = [8, 16], sizes = [8, 8], strides = [1, 1]} : vector<16x32xf32> to vector<8x8xf32>
    %cst_24 = arith.constant dense<0.000000e+00> : vector<8x8xf32>
    %144 = tpu.matmul %140, %143, %cst_24 {dimension_numbers = #tpu.dot_dimension_numbers<[1], [0], [0], [1], [0, 0, 1, 1], [], []>} : vector<8x8xf32>, vector<8x8xf32>, vector<8x8xf32> -> vector<8x8xf32>
    %145 = tpu.reciprocal %142 {approx = true} : vector<8x1xf32> -> vector<8x1xf32>
    %146 = vector.broadcast %145 : vector<8x1xf32> to vector<8x8xf32>
    %147 = arith.mulf %144, %146 : vector<8x8xf32>
    %148 = vector.extract_strided_slice %34 {offsets = [7, 0], sizes = [1, 8], strides = [1, 1]} : vector<8x64xf32> to vector<1x8xf32>
    %149 = vector.extract_strided_slice %34 {offsets = [7, 8], sizes = [1, 8], strides = [1, 1]} : vector<8x64xf32> to vector<1x8xf32>
    %150 = vector.extract_strided_slice %34 {offsets = [7, 16], sizes = [1, 8], strides = [1, 1]} : vector<8x64xf32> to vector<1x8xf32>
    %151 = vector.extract_strided_slice %34 {offsets = [7, 24], sizes = [1, 8], strides = [1, 1]} : vector<8x64xf32> to vector<1x8xf32>
    %152 = vector.extract_strided_slice %34 {offsets = [7, 32], sizes = [1, 8], strides = [1, 1]} : vector<8x64xf32> to vector<1x8xf32>
    %153 = vector.extract_strided_slice %34 {offsets = [7, 40], sizes = [1, 8], strides = [1, 1]} : vector<8x64xf32> to vector<1x8xf32>
    %154 = vector.extract_strided_slice %34 {offsets = [7, 48], sizes = [1, 8], strides = [1, 1]} : vector<8x64xf32> to vector<1x8xf32>
    %155 = vector.extract_strided_slice %34 {offsets = [7, 56], sizes = [1, 8], strides = [1, 1]} : vector<8x64xf32> to vector<1x8xf32>
    %156 = tpu.concatenate %148, %149, %150, %151, %152, %153, %154, %155 in 0 : vector<1x8xf32>, vector<1x8xf32>, vector<1x8xf32>, vector<1x8xf32>, vector<1x8xf32>, vector<1x8xf32>, vector<1x8xf32>, vector<1x8xf32> -> vector<8x8xf32>
    %cst_25 = arith.constant dense<0.000000e+00> : vector<8xf32>
    %157 = vector.multi_reduction <add>, %156, %cst_25 [1] : vector<8x8xf32> to vector<8xf32>
    %158 = vector.shape_cast %157 : vector<8xf32> to vector<8x1xf32>
    %159 = vector.extract_strided_slice %0 {offsets = [8, 24], sizes = [8, 8], strides = [1, 1]} : vector<16x32xf32> to vector<8x8xf32>
    %cst_26 = arith.constant dense<0.000000e+00> : vector<8x8xf32>
    %160 = tpu.matmul %156, %159, %cst_26 {dimension_numbers = #tpu.dot_dimension_numbers<[1], [0], [0], [1], [0, 0, 1, 1], [], []>} : vector<8x8xf32>, vector<8x8xf32>, vector<8x8xf32> -> vector<8x8xf32>
    %161 = tpu.reciprocal %158 {approx = true} : vector<8x1xf32> -> vector<8x1xf32>
    %162 = vector.broadcast %161 : vector<8x1xf32> to vector<8x8xf32>
    %163 = arith.mulf %160, %162 : vector<8x8xf32>
    %164 = tpu.concatenate %115, %131, %147, %163 in 1 : vector<8x8xf32>, vector<8x8xf32>, vector<8x8xf32>, vector<8x8xf32> -> vector<8x32xf32>
    %165 = tpu.concatenate %99, %164 in 0 : vector<8x32xf32>, vector<8x32xf32> -> vector<16x32xf32>
    %c0_27 = arith.constant 0 : index
    %c0_28 = arith.constant 0 : index
    %166 = vector.load %arg6[%c0_27, %c0_28] : memref<32x32xf32, #tpu.memory_space<vmem>>, vector<32x32xf32>
    %cst_29 = arith.constant dense<0.000000e+00> : vector<16x32xf32>
    %167 = tpu.matmul %165, %166, %cst_29 {dimension_numbers = #tpu.dot_dimension_numbers<[1], [0], [0], [1], [0, 0, 1, 1], [], []>} : vector<16x32xf32>, vector<32x32xf32>, vector<16x32xf32> -> vector<16x32xf32>
    %c0_30 = arith.constant 0 : index
    %c0_31 = arith.constant 0 : index
    %168 = vector.load %arg7[%c0_30, %c0_31] : memref<1x32xf32, #tpu.memory_space<vmem>>, vector<1x32xf32>
    %169 = vector.broadcast %168 : vector<1x32xf32> to vector<16x32xf32>
    %170 = arith.addf %167, %169 : vector<16x32xf32>
    %c0_32 = arith.constant 0 : index
    %c0_33 = arith.constant 0 : index
    %171 = vector.load %arg8[%c0_32, %c0_33] : memref<16x32xf32, #tpu.memory_space<vmem>>, vector<16x32xf32>
    tpu.vector_store %arg8[%c0_32, %c0_33], %170 {strides = array<i32>} : memref<16x32xf32, #tpu.memory_space<vmem>>, vector<16x32xf32>,
    return
  }
  func.func @transform_0(%arg0: i32) -> (i32, i32) {
    %c0_i32 = arith.constant 0 : i32
    %c0_i32_0 = arith.constant 0 : i32
    return %arg0, %c0_i32 : i32, i32
  }
  func.func @transform_1(%arg0: i32) -> (i32, i32) {
    %c0_i32 = arith.constant 0 : i32
    %c0_i32_0 = arith.constant 0 : i32
    %c0_i32_1 = arith.constant 0 : i32
    return %c0_i32, %c0_i32_0 : i32, i32
  }
  func.func @transform_2(%arg0: i32) -> (i32, i32) {
    %c0_i32 = arith.constant 0 : i32
    %c0_i32_0 = arith.constant 0 : i32
    %c0_i32_1 = arith.constant 0 : i32
    return %c0_i32, %c0_i32_0 : i32, i32
  }
  func.func @transform_3(%arg0: i32) -> (i32, i32) {
    %c0_i32 = arith.constant 0 : i32
    %c0_i32_0 = arith.constant 0 : i32
    %c0_i32_1 = arith.constant 0 : i32
    return %c0_i32, %c0_i32_0 : i32, i32
  }
  func.func @transform_4(%arg0: i32) -> (i32, i32) {
    %c0_i32 = arith.constant 0 : i32
    %c0_i32_0 = arith.constant 0 : i32
    %c0_i32_1 = arith.constant 0 : i32
    return %c0_i32, %c0_i32_0 : i32, i32
  }
  func.func @transform_5(%arg0: i32) -> (i32, i32) {
    %c0_i32 = arith.constant 0 : i32
    %c0_i32_0 = arith.constant 0 : i32
    %c0_i32_1 = arith.constant 0 : i32
    return %c0_i32, %c0_i32_0 : i32, i32
  }
  func.func @transform_6(%arg0: i32) -> (i32, i32) {
    %c0_i32 = arith.constant 0 : i32
    %c0_i32_0 = arith.constant 0 : i32
    %c0_i32_1 = arith.constant 0 : i32
    return %c0_i32, %c0_i32_0 : i32, i32
  }
  func.func @transform_7(%arg0: i32) -> (i32, i32) {
    %c0_i32 = arith.constant 0 : i32
    %c0_i32_0 = arith.constant 0 : i32
    return %arg0, %c0_i32 : i32, i32
  }
}

</mosaic_0001>

<bundles_post_ra>
// kernel: tpu_custom_call.1
= control target key start
LH: loop header
LB: loop body
LE: loop exit
PB: predicated region body
PF: predicated region fallthrough
CT: control target
= control target key end

     0   :  { %s2721_s0 = inlined_call_operand.hbm [shape: f32[32,32], index: 0, kind: input, shape index: {}]   ;;  %s2722_s1 = inlined_call_operand.hbm [shape: f32[8,32], index: 1, kind: input, shape index: {}]   ;;  %s2723_s2 = inlined_call_operand.vmem [shape: f32[8,1], index: 2, kind: input, shape index: {}]   ;;  %s2724_s3 = inlined_call_operand.vmem [shape: f32[16,64], index: 3, kind: input, shape index: {}]   ;;  %s2725_s4 = inlined_call_operand.vmem [shape: f32[1,64], index: 4, kind: input, shape index: {}]   ;;  %s2726_s5 = inlined_call_operand.hbm [shape: f32[32,32], index: 5, kind: input, shape index: {}]   ;;  %s2727_s6 = inlined_call_operand.vmem [shape: f32[1,32], index: 6, kind: input, shape index: {}]   ;;  %s2728_s7 = inlined_call_operand.hbm [shape: f32[32,32], index: 7, kind: output, shape index: {}]  }
   0x1   :  { %2737 = sst [smem:[#allocation15_spill]] %s2722_s1 }
   0x2   :  { %12 = vsyncpa [#allocation3], 0 }
   0x3   :  { %14 = vsyncpa [#allocation3 + $0x1], 0 }
   0x4   :  { %15 = vsyncpa [#allocation6], 0 }
   0x5   :  { %16 = vsyncpa [#allocation4], 0 }
   0x6   :  { %18 = vsyncpa [#allocation4 + $0x1], 0  ;;  %s2137_s24 = smov 0   ;;  %s2139_s25 = smov 0  }
   0x7   :  { %s2141_s26 = smov 0   ;;  %s2143_s27 = smov 0  }
   0x8 LB: > { %2738 = sst [smem:[#allocation12_spill]] %s2070_s26  ;;  %s2158_s28 = sadd.s32 4294967295, %s2074_s27   ;;  %s2074_s27 = sphi %s2143_s27, %s2758_s27   ;;  %s2070_s26 = sphi %s2141_s26, %s2760_s26   ;;  %s2066_s25 = sphi %s2139_s25, %s2762_s25   ;;  %s2062_s24 = sphi %s2137_s24, %s2761_s24  }
   0x9   : > { %s1671_s29 = sadd.s32 4294967294, %s2074_s27   ;;  %s2162_s30 = sadd.s32 1, %s2074_s27  }
   0xa   : > { %2739 = sst [smem:[#allocation13_spill]] %s2162_s30  ;;  %s31_s8 = sadd.s32 1, %s2070_s26 }
   0xb   : > { %s28_s9 = ssub.s32 %s2074_s27, %s2162_s30  ;;  %p38_p0 = scmp.ne.s32.totalorder %s2070_s26, %s2066_s25 }
   0xc   : > { %p29_p1 = scmp.eq.s32.totalorder %s28_s9, 0  ;;  %p39_p2 = scmp.eq.s32.totalorder %s2074_s27, 0 }
   0xd   : > { %p44_p3 = scmp.ne.s32.totalorder %s2066_s25, %s2062_s24  ;;  %p2729_p4 = scmp.eq.s32.totalorder %s2158_s28, 0 }
   0xe   : > { %s2174_s10 = scalar_select %p29_p1, %s2070_s26, %s31_s8  }
   0xf   : > { %p2176_p5 = por %p39_p2, %p38_p0  ;;  %p2182_p6 = por %p2729_p4, %p44_p3 }
  0x10   : > { %2740 = sst [smem:[#allocation14_spill]] %s2174_s10  ;;  %p194_p7 = scmp.eq.s32.totalorder %s2158_s28, 1 }
  0x11   : > { %s2742_s12 = scalar_select %p2182_p6, 1, 0 }
  0x12   : > { %p200_p8 = scmp.eq.s32.totalorder %s1671_s29, 1  ;;  %p1672_p9 = scmp.ge.s32.totalorder %s2074_s27, 1 }
  0x13   : > { %p207_p10 = scmp.lt.s32.totalorder %s2074_s27, 3  ;;  %p2189_p11 = por %p194_p7, %p38_p0 }
  0x14   : > { %p2193_p12 = por %p200_p8, %p44_p3  ;;  %s2076_s16 = smov [#allocation5]  }
  0x15   : > { %s2743_s13 = scalar_select %p2189_p11, 1, 0 }
  0x16   : > { %s2744_s14 = scalar_select %p2193_p12, 1, 0 }
  0x17   : > { %p2197_p13 = pnand %p1672_p9, %p207_p10  ;;  %s220_s17 = sshll.u32 %s2076_s16, 4  ;;  %s221_s17 = int_to_ptr.vmem [resolvable:$true] %s220_s17 }
  0x18   : > { %p1844_p4 = scmp.lt.s32.totalorder %s2074_s27, 2  ;;  %p2746_p0 = scmp.eq.s32.totalorder %s2158_s28, 0 }
  0x19   : > { %s2745_s15 = scalar_select %p2197_p13, 1, 0 }
  0x1a   : > { %p1827_p2 = pneg %p2197_p13  ;;  %p2213_p3 = pnand %p1844_p4, %p2176_p5 }
  0x1b   : > { %s2077_s20 = smov [#allocation7]   ;;  %s2749_s1 = sld [smem:[#allocation15_spill]] }
  0x1c   : > { %p2207_p7 = pnand %p1827_p2, %p2746_p0  ;;  %s239_s21 = sshll.u32 %s2077_s20, 4  ;;  %s2217_s21 = int_to_ptr.vmem [resolvable:$true] %s239_s21 }
  0x1d   : > { %s2748_s19 = scalar_select %p2213_p3, 1, 0 }
  0x1e   : > { %p1920_p9 = pneg %p2207_p7 }
  0x21   : > { %s1918_s29 = scalar_lea.hbm %s2749_s1, 128 }
  0x22   : > { %p1919_p8 = scmp.ne.s32.totalorder %s2749_s1, %s1918_s29  ;;  %p1925_p10 = scmp.lt.u32.totalorder %s1918_s29, %s2749_s1 }
  0x24   : > { %p1921_p4 = pnand %p1920_p9, %p1919_p8 }
  0x26   : > { %p1922_p5 = pneg %p1921_p4 }
  0x28   : > { %p1927_p2 = pnand %p1925_p10, %p1922_p5 }
  0x2a   : > { %1930 = shalt.err (!%p1927_p2)
}
  0x2b   : > { %s1931_s20 = scalar_lea.vmem %s221_s17, 128  ;;  %p1939_p11 = scmp.lt.s32.totalorder %s221_s17, %s221_s17 }
  0x2c   : > { %p1932_p0 = scmp.ne.s32.totalorder %s221_s17, %s1931_s20  ;;  %p1940_p6 = scmp.lt.s32.totalorder %s1931_s20, %s1931_s20 }
  0x2e   : > { %p1934_p1 = pnand %p1932_p0, %p1920_p9  ;;  %p1941_p13 = por %p1940_p6, %p1939_p11 }
  0x30   : > { %p1935_p12 = pneg %p1934_p1 }
  0x32   : > { %p1942_p3 = pnand %p1941_p13, %p1935_p12 }
  0x34   : > { %1945 = shalt.err (!%p1942_p3)
}
  0x35   : > { %1830 = dma.hbm_to_vmem [thread:$0]  (!%p2207_p7), %s2749_s1, 128, %s221_s17, [#allocation6]  }
  0x36   : > { %s256_s29 = sand.u32 1, %s2070_s26   ;;  %s1946_s11 = scalar_lea.hbm %s2726_s5, 512 }
  0x37   : > { %p1947_p1 = scmp.ne.s32.totalorder %s2726_s5, %s1946_s11  ;;  %p1953_p12 = scmp.lt.u32.totalorder %s1946_s11, %s2726_s5 }
  0x39   : > { %p1949_p6 = pnand %p1947_p1, %p1920_p9 }
  0x3b   : > { %p1950_p11 = pneg %p1949_p6 }
  0x3d   : > { %p1955_p13 = pnand %p1953_p12, %p1950_p11 }
  0x3f   : > { %1958 = shalt.err (!%p1955_p13)
}
  0x40   : > { %s1959_s17 = scalar_lea.vmem %s2217_s21, 512  ;;  %p1967_p5 = scmp.lt.s32.totalorder %s2217_s21, %s2217_s21 }
  0x41   : > { %p1960_p3 = scmp.ne.s32.totalorder %s2217_s21, %s1959_s17  ;;  %p1968_p10 = scmp.lt.s32.totalorder %s1959_s17, %s1959_s17 }
  0x43   : > { %p1962_p8 = pnand %p1960_p3, %p1920_p9  ;;  %p1969_p2 = por %p1968_p10, %p1967_p5 }
  0x45   : > { %p1963_p4 = pneg %p1962_p8 }
  0x47   : > { %p1970_p0 = pnand %p1969_p2, %p1963_p4 }
  0x49   : > { %1973 = shalt.err (!%p1970_p0)
}
  0x4a   : > { %s2078_s30 = smov 128   ;;  %s2079_s10 = smov 8  }
  0x4b   : > { %1833 = dma.hbm_to_vmem [thread:$0]  (!%p2207_p7), %s2726_s5, 512, %s2217_s21, [#allocation6], %s2078_s30, %s2078_s30, %s2079_s10  }
  0x4c   : > { %s1676_s8 = sshll.u32 %s256_s29, 4  ;;  %s1705_s9 = sshll.u32 %s2074_s27, 8 }
  0x4d   : > { %s2274_s20 = scalar_lea.hbm %s2721_s0, %s1705_s9  ;;  %s260_s17 = scalar_lea.vmem [#allocation2], %s1676_s8 }
  0x4e   : > { %s267_s18 = sshll.u32 %s260_s17, 4  ;;  %s2278_s1 = scalar_lea.sflag [#allocation3], %s256_s29  ;;  %s2276_s18 = int_to_ptr.vmem [resolvable:$true] %s267_s18 }
  0x4f   : > { %s1974_s26 = scalar_lea.hbm %s2274_s20, 256  ;;  %p2750_p7 = scmp.ne.s32.totalorder %s2748_s19, 0 }
  0x50   : > { %p1975_p9 = scmp.ne.s32.totalorder %s2274_s20, %s1974_s26  ;;  %s1979_s23 = scalar_lea.hbm %s2721_s0, 512 }
  0x51   : > { %p1976_p1 = pneg %p2750_p7  ;;  %p1980_p12 = scmp.lt.u32.totalorder %s2274_s20, %s2721_s0 }
  0x52   : > { %p1981_p13 = scmp.lt.u32.totalorder %s1979_s23, %s1974_s26  ;;  %p1983_p8 = scmp.lt.u32.totalorder %s1974_s26, %s2274_s20 }
  0x53   : > { %p1977_p6 = pnand %p1976_p1, %p1975_p9 }
  0x54   : > { %p1982_p3 = por %p1981_p13, %p1980_p12 }
  0x55   : > { %p1978_p11 = pneg %p1977_p6 }
  0x56   : > { %p1984_p4 = por %p1983_p8, %p1982_p3 }
  0x58   : > { %p1985_p5 = pnand %p1984_p4, %p1978_p11 }
  0x5a   : > { %1988 = shalt.err (!%p1985_p5)
}
  0x5b   : > { %s1989_s29 = scalar_lea.vmem %s2276_s18, 256  ;;  %s2080_s8 = smov [#allocation2]  }
  0x5c   : > { %p1990_p10 = scmp.ne.s32.totalorder %s2276_s18, %s1989_s29  ;;  %s1994_s16 = sshll.u32 %s2080_s8, 4  ;;  %s1995_s16 = int_to_ptr.vmem [resolvable:$false] %s1994_s16 }
  0x5d   : > { %s1996_s17 = scalar_lea.vmem %s1995_s16, 512  ;;  %p1997_p9 = scmp.lt.s32.totalorder %s2276_s18, %s1995_s16 }
  0x5e   : > { %p1992_p2 = pnand %p1990_p10, %p1976_p1  ;;  %p1998_p6 = scmp.lt.s32.totalorder %s1996_s17, %s1989_s29 }
  0x60   : > { %p1993_p0 = pneg %p1992_p2  ;;  %p1999_p12 = por %p1998_p6, %p1997_p9 }
  0x62   : > { %p2000_p13 = pnand %p1999_p12, %p1993_p0 }
  0x64   : > { %2003 = shalt.err (!%p2000_p13)
}
  0x65   : > { %1837 = dma.hbm_to_vmem [thread:$0]  (!%p2750_p7), %s2274_s20, 256, %s2276_s18, %s2278_s1, %s2078_s30, %s2078_s30, %s2079_s10  }
  0x66   : > { %p2751_p1 = scmp.ne.s32.totalorder %s2745_s15, 0 }
  0x67   : > { %s2312_s26 = sand.u32 (!%p2751_p1), 1, %s2066_s25   ;;  %p2752_p11 = scmp.ne.s32.totalorder (!%p2751_p1), %s2742_s12, 0 }
  0x68   : > { %279 = sbr.rel (%p2751_p1) target bundleno = 1763 (0x6e3), region = 48  ;;  %s1680_s21 = sshll.u32 (!%p2751_p1), %s2312_s26, 4 }
  0x69   : > { %s282_s22 = scalar_lea.sflag (!%p2751_p1), [#allocation3], %s2312_s26  ;;  %s285_s19 = scalar_lea.vmem (!%p2751_p1), [#allocation2], %s1680_s21 }
  0x6f   : > { %2049 = dma.done.wait (%p2752_p11), %s282_s22, 256  }
  0x70   : > { %2051 = vsyncadd (%p2752_p11), %s282_s22, 4294967040  ;;  %p2753_p7 = scmp.eq.s32.totalorder %s2158_s28, 0 }
  0x72   : > { %2053 = dma.done.wait (%p2753_p7), [#allocation6], 640   ;;  %p2754_p3 = pmov %p2753_p7 }
  0x73   : > { %v2081_v0 = vmov 0.0|0.0   ;;  %vm2082_vm0 = vmmov 0   ;;  %v2083_v1 = vmov 0.0   ;;  %v2084_v2 = vmov 0   ;;  %v2330_v3 = vld [vmem:[%s285_s19] sm:$0xff]  ;;  %v2332_v4 = vld [vmem:[%s285_s19 + $0x8] sm:$0xff] }
  0x74   : > { %2055 = vsyncadd (%p2754_p3), [#allocation6], 4294966656  ;;  %1800 = vmatprep.subr.bf16.mxu0 %v2081_v0  ;;  %1739 = vmatprep.mubr.msk.f32.mxu0 %vm2082_vm0, %v2083_v1  ;;  %vm335_vm1 = vcmask 261120   ;;  %v1801_v5 = vpack.c.bf16 %v2332_v4, %v2330_v3  ;;  %v329_v6 = vld [vmem:[%s2723_s2] sm:$0xff]  ;;  %v470_v13 = vld [vmem:[%s2724_s3 + $0x8] sm:$0xff]  ;;  %vm438_vm3 = vcmask 1040384  }
  0x75   : > { %1899 = vset.pattern.permute.xlu0 %v2084_v2  ;;  %1804 = vmatprep.subr.bf16.mxu1 %v2081_v0  ;;  %vm1802_vm2 = vmpackc.low %vm335_vm1, %vm335_vm1  ;;  %v328_v7 = vld [vmem:[#allocation5] sm:$0xff]  ;;  %vm440_vm4 = vcmask 1041408   ;;  %s2085_s18 = smov 120   ;;  %vm442_vm5 = vcmask 1042432   ;;  %s2086_s23 = smov 112   ;;  %vm444_vm6 = vcmask 1043456  }
  0x76   : > { %1746 = vmatprep.mubr.msk.f32.mxu1 %vm2082_vm0, %v2083_v1  ;;  %332 = vperm.xlu0 %1899, %v329_v6   ;;  %v469_v12 = vld [vmem:[%s2724_s3] sm:$0xff]  ;;  %vm446_vm7 = vcmask 1044480   ;;  %vm448_vm8 = vcmask 1045504   ;;  %vm450_vm9 = vcmask 1046528   ;;  %s2087_s9 = smov 8   ;;  %vm467_vm10 = vcmask 64512  }
  0x77   : > { %1803 = vmatpush3.bf16.xpose.msk.msra.mxu0 %vm1802_vm2, %v1801_v5  ;;  %v1805_v14 = vpack.c.bf16 %v470_v13, %v469_v12  ;;  %vm478_vm11 = vcmask 130048   ;;  %v1687_v43 = vld [vmem:[%s2725_s4] ss:$0 sm:$0xff]  ;;  %vm552_vm12 = vcmask 523264   ;;  %s2088_s8 = smov 104   ;;  %s2089_s16 = smov 96  }
  0x78   : > { %1754 = vmatprep.subr.mxu0 %v2083_v1  ;;  %s2090_s17 = smov 88   ;;  %s2091_s22 = smov 80   ;;  %vm1017_vm13 = vcmask 195584  }
  0x79   : > { %1806 = vmatpush3.bf16.msra.mxu1 %v1805_v14  ;;  %s2092_s19 = smov 72   ;;  %s2093_s1 = smov 16  }
  0x7a   : > { %1749 = vmatprep.subr.mxu1 %v2083_v1  ;;  %s2094_s12 = smov 24   ;;  %s323_s10 = scalar_lea.vmem [#allocation8], %s1680_s21 }
  0x7b   : > { %s1579_s20 = sshll.u32 %s323_s10, 4  ;;  %s1566_s21 = scalar_lea.sflag [#allocation4], %s2312_s26  ;;  %s2669_s20 = int_to_ptr.vmem [resolvable:$true] %s1579_s20 }
  0x7c   : > { %p2755_p4 = scmp.ne.s32.totalorder %s2743_s13, 0 }
  0x7e   : > { %1740 = vmatmul.mubr.msk.f32.vlgmr.msra.gmra.mrb[0].mxu0 %vm335_vm1, %v328_v7 }
  0x7f   : > { %1756 = vmatprep.mubr.msk.f32.mxu0 %vm2082_vm0, %v2083_v1 }
  0xf5   : > { %v333_v8 = vpop.permute.xlu0 %332 }
 0x151   : > { %v411_v9 = vpop.f32.mrb[0].mxu0 }
 0x152   : > { %v412_v10 = vadd.f32 %v411_v9, %v333_v8  ;;  %v1741_v11 = vpop.f32.mrb[1].mxu0 }
 0x154   : > { %v430_v15 = vrot.slane %v412_v10, 6  ;;  %v426_v16 = vrot.slane %v412_v10, 5  ;;  %v416_v17 = vrot.slane %v412_v10, 1  ;;  %v418_v18 = vrot.slane %v412_v10, 2 }
 0x155   : > { %v420_v19 = vrot.slane %v412_v10, 3  ;;  %v422_v20 = vrot.slane %v412_v10, 4  ;;  %v434_v23 = vrot.slane %v412_v10, 7 }
 0x156   : > { %431 = vrot.lane.b32.xlu1 %v430_v15, %s2085_s18  ;;  %427 = vrot.lane.b32.xlu0 %v426_v16, %s2085_s18  ;;  %v456_v21 = vsel %vm438_vm3, %v416_v17, %v418_v18  ;;  %v439_v22 = vsel %vm438_vm3, %v412_v10, %v416_v17 }
 0x157   : > { %v457_v24 = vsel %vm440_vm4, %v456_v21, %v420_v19  ;;  %v441_v25 = vsel %vm440_vm4, %v439_v22, %v418_v18 }
 0x158   : > { %v458_v26 = vsel %vm442_vm5, %v457_v24, %v422_v20  ;;  %v443_v27 = vsel %vm442_vm5, %v441_v25, %v420_v19 }
 0x15a   : > { %435 = vrot.lane.b32.xlu1 %v434_v23, %s2085_s18  ;;  %453 = vrot.lane.b32.xlu0 %v412_v10, %s2085_s18 }
 0x15e   : > { %423 = vrot.lane.b32.xlu1 %v422_v20, %s2085_s18 }
 0x162   : > { %815 = vrot.lane.b32.xlu1 %v2330_v3, %s2086_s23 }
 0x166   : > { %1158 = vrot.lane.b32.xlu1 %v2332_v4, %s2085_s18 }
 0x16a   : > { %1268 = vrot.lane.b32.xlu1 %v2332_v4, %s2086_s23 }
 0x1c8   : > { %v432_v28 = vpop.permute.xlu1 %431  ;;  %v428_v29 = vpop.permute.xlu0 %427 }
 0x1c9   : > { %v459_v30 = vsel %vm444_vm6, %v458_v26, %v428_v29 }
 0x1ca   : > { %v460_v32 = vsel %vm446_vm7, %v459_v30, %v432_v28 }
 0x1cc   : > { %v436_v31 = vpop.permute.xlu1 %435  ;;  %v454_v33 = vpop.permute.xlu0 %453 }
 0x1cd   : > { %v461_v34 = vsel %vm448_vm8, %v460_v32, %v436_v31 }
 0x1ce   : > { %v462_v35 = vsel %vm450_vm9, %v461_v34, %v454_v33 }
 0x1cf   : > { %464 = vrot.lane.b32.xlu0 %v462_v35, %s2087_s9 }
 0x1d0   : > { %v424_v36 = vpop.permute.xlu1 %423 }
 0x1d1   : > { %v445_v37 = vsel %vm444_vm6, %v443_v27, %v424_v36 }
 0x1d2   : > { %v447_v38 = vsel %vm446_vm7, %v445_v37, %v428_v29 }
 0x1d3   : > { %v449_v39 = vsel %vm448_vm8, %v447_v38, %v432_v28  ;;  %705 = vrot.lane.b32.xlu0 %v2330_v3, %s2085_s18 }
 0x1d4   : > { %v451_v40 = vsel %vm450_vm9, %v449_v39, %v436_v31  ;;  %v2391_v48 = vpop.permute.xlu1 %815 }
 0x1d7   : > { %925 = vrot.lane.b32.xlu0 %v2330_v3, %s2088_s8 }
 0x1d8   : > { %v2393_v49 = vpop.permute.xlu1 %1158 }
 0x1dc   : > { %v2396_v51 = vpop.permute.xlu1 %1268 }
 0x241   : > { %v465_v41 = vpop.permute.xlu0 %464 }
 0x242   : > { %v468_v42 = vsel %vm467_vm10, %v451_v40, %v465_v41 }
 0x243   : > { %1747 = vmatmul.mubr.msk.f32.vlgmr.msra.gmra.mrb[0].mxu1 %vm478_vm11, %v468_v42 }
 0x244   : > { %1750 = vmatpush3.msra.mxu1 %v2330_v3  ;;  %1751 = vmatprep.mubr.msk.f32.mxu1 %vm2082_vm0, %v2083_v1 }
 0x245   : > { %1759 = vmatprep.subr.mxu1 %v2083_v1  ;;  %v706_v50 = vpop.permute.xlu0 %705 }
 0x246   : > { %1755 = vmatpush3.msra.mxu0 %v706_v50 }
 0x247   : > { %1764 = vmatprep.subr.mxu0 %v2083_v1 }
 0x249   : > { %v926_v63 = vpop.permute.xlu0 %925 }
 0x316   : > { %v548_v44 = vpop.f32.mrb[0].mxu1 }
 0x317   : > { %v549_v45 = vadd.f32 %v1687_v43, %v548_v44  ;;  %v1748_v46 = vpop.f32.mrb[1].mxu1 }
 0x319   : > { %v553_v47 = vsel %vm552_vm12, %v549_v45, -inf }
 0x31a   : > { %554 = vmax.xlane.f32.xlu1 %v553_v47 }
 0x3a7   : > { %v555_v52 = vpop.xlane.xlu1 %554 }
 0x3a8   : > { %v556_v53 = vsub.f32 %v549_v45, %v555_v52 }
 0x3aa   : > { %v557_v54 = vmul.f32 1.442695, %v556_v53 }
 0x3ac   : > { %1900 = vpow2.f32 %v557_v54 }
 0x3b6   : > { %v2398_v55 = vpop.eup %1900 }
 0x3b7   : > { %1029 = vrot.lane.b32.xlu1 %v2398_v55, %s2089_s16  ;;  %674 = vrot.lane.b32.xlu0 %v2398_v55, %s2085_s18  ;;  %v2409_v56 = vrot.slane %v2398_v55, 1  ;;  %v2420_v57 = vrot.slane %v2398_v55, 7  ;;  %v2427_v58 = vrot.slane %v2398_v55, 2  ;;  %v2430_v59 = vrot.slane %v2398_v55, 6 }
 0x3b8   : > { %v2437_v60 = vrot.slane %v2398_v55, 5  ;;  %v2448_v61 = vrot.slane %v2398_v55, 3  ;;  %v2451_v62 = vrot.slane %v2398_v55, 4 }
 0x3bb   : > { %1139 = vrot.lane.b32.xlu1 %v2398_v55, %s2090_s17  ;;  %787 = vrot.lane.b32.xlu0 %v2398_v55, %s2086_s23 }
 0x3bf   : > { %900 = vrot.lane.b32.xlu0 %v2398_v55, %s2088_s8  ;;  %784 = vrot.lane.b32.xlu1 %v2409_v56, %s2085_s18 }
 0x3c3   : > { %1252 = vrot.lane.b32.xlu0 %v2398_v55, %s2091_s22  ;;  %585 = vrot.lane.b32.xlu1 %v2409_v56, %s2092_s19 }
 0x3c7   : > { %790 = vrot.lane.b32.xlu1 %v2420_v57, %s2088_s8  ;;  %561 = vrot.lane.b32.xlu0 %v2420_v57, %s2085_s18 }
 0x3cb   : > { %692 = vrot.lane.b32.xlu1 %v2427_v58, %s2092_s19  ;;  %565 = vrot.lane.b32.xlu0 %v2430_v59, %s2086_s23 }
 0x3cf   : > { %793 = vrot.lane.b32.xlu1 %v2430_v59, %s2089_s16  ;;  %569 = vrot.lane.b32.xlu0 %v2437_v60, %s2088_s8 }
 0x3d3   : > { %796 = vrot.lane.b32.xlu1 %v2437_v60, %s2090_s17  ;;  %677 = vrot.lane.b32.xlu0 %v2420_v57, %s2086_s23 }
 0x3d7   : > { %1020 = vrot.lane.b32.xlu1 %v2448_v61, %s2085_s18  ;;  %573 = vrot.lane.b32.xlu0 %v2451_v62, %s2089_s16 }
 0x3db   : > { %906 = vrot.lane.b32.xlu1 %v2430_v59, %s2090_s17  ;;  %680 = vrot.lane.b32.xlu0 %v2430_v59, %s2088_s8 }
 0x3df   : > { %1127 = vrot.lane.b32.xlu1 %v2451_v62, %s2085_s18  ;;  %577 = vrot.lane.b32.xlu0 %v2448_v61, %s2090_s17 }
 0x3e3   : > { %1026 = vrot.lane.b32.xlu1 %v2409_v56, %s2088_s8  ;;  %683 = vrot.lane.b32.xlu0 %v2437_v60, %s2089_s16 }
 0x3e7   : > { %912 = vrot.lane.b32.xlu1 %v2451_v62, %s2092_s19  ;;  %581 = vrot.lane.b32.xlu0 %v2427_v58, %s2091_s22 }
 0x3eb   : > { %1032 = vrot.lane.b32.xlu1 %v2420_v57, %s2090_s17  ;;  %686 = vrot.lane.b32.xlu0 %v2451_v62, %s2090_s17 }
 0x3ef   : > { %1237 = vrot.lane.b32.xlu1 %v2437_v60, %s2085_s18  ;;  %894 = vrot.lane.b32.xlu0 %v2427_v58, %s2085_s18 }
 0x3f3   : > { %1347 = vrot.lane.b32.xlu1 %v2430_v59, %s2085_s18  ;;  %689 = vrot.lane.b32.xlu0 %v2448_v61, %s2091_s22  ;;  %s1706_s18 = sshll.u32 %s2158_s28, 8  ;;  %s2004_s28 = scalar_lea.vmem %s2669_s20, 256 }
 0x3f4   : > { %s2674_s29 = scalar_lea.hbm %s2728_s7, %s1706_s18  ;;  %p2005_p8 = scmp.ne.s32.totalorder %s2669_s20, %s2004_s28 }
 0x3f6   : > { %p2006_p5 = pnand %p2005_p8, %p2755_p4 }
 0x3f7   : > { %1142 = vrot.lane.b32.xlu1 %v2420_v57, %s2091_s22  ;;  %897 = vrot.lane.b32.xlu0 %v2409_v56, %s2086_s23 }
 0x3f8   : > { %p2007_p10 = pneg %p2006_p5 }
 0x3fb   : > { %1350 = vrot.lane.b32.xlu1 %v2437_v60, %s2086_s23  ;;  %903 = vrot.lane.b32.xlu0 %v2420_v57, %s2089_s16 }
 0x3ff   : > { %1353 = vrot.lane.b32.xlu1 %v2451_v62, %s2088_s8  ;;  %799 = vrot.lane.b32.xlu0 %v2451_v62, %s2091_s22 }
 0x403   : > { %1356 = vrot.lane.b32.xlu1 %v2448_v61, %s2089_s16  ;;  %1023 = vrot.lane.b32.xlu0 %v2427_v58, %s2086_s23 }
 0x407   : > { %1359 = vrot.lane.b32.xlu1 %v2427_v58, %s2090_s17  ;;  %802 = vrot.lane.b32.xlu0 %v2448_v61, %s2092_s19 }
 0x40b   : > { %1365 = vrot.lane.b32.xlu1 %v2398_v55, %s2092_s19  ;;  %909 = vrot.lane.b32.xlu0 %v2437_v60, %s2091_s22 }
 0x40f   : > { %1130 = vrot.lane.b32.xlu0 %v2448_v61, %s2086_s23 }
 0x413   : > { %1133 = vrot.lane.b32.xlu0 %v2427_v58, %s2088_s8 }
 0x417   : > { %1136 = vrot.lane.b32.xlu0 %v2409_v56, %s2089_s16 }
 0x41b   : > { %1035 = vrot.lane.b32.xlu0 %v2430_v59, %s2091_s22 }
 0x41f   : > { %1240 = vrot.lane.b32.xlu0 %v2451_v62, %s2086_s23 }
 0x423   : > { %1038 = vrot.lane.b32.xlu0 %v2437_v60, %s2092_s19 }
 0x427   : > { %1243 = vrot.lane.b32.xlu0 %v2448_v61, %s2088_s8 }
 0x429   : > { %v675_v0 = vpop.permute.xlu0 %674  ;;  %v2527_v3 = vpop.permute.xlu1 %1029 }
 0x42a   : > { %v695_v32 = vsel %vm438_vm3, %v2409_v56, %v675_v0 }
 0x42b   : > { %1145 = vrot.lane.b32.xlu0 %v2430_v59, %s2092_s19 }
 0x42d   : > { %v788_v2 = vpop.permute.xlu0 %787  ;;  %v2535_v7 = vpop.permute.xlu1 %1139 }
 0x42f   : > { %1246 = vrot.lane.b32.xlu0 %v2427_v58, %s2089_s16 }
 0x431   : > { %v2529_v5 = vpop.permute.xlu0 %900  ;;  %v785_v9 = vpop.permute.xlu1 %784 }
 0x432   : > { %v805_v47 = vsel %vm438_vm3, %v2427_v58, %v785_v9 }
 0x433   : > { %1249 = vrot.lane.b32.xlu0 %v2409_v56, %s2090_s17  ;;  %v806_v50 = vsel %vm440_vm4, %v805_v47, %v788_v2 }
 0x435   : > { %v2533_v6 = vpop.permute.xlu0 %1252  ;;  %v586_v12 = vpop.permute.xlu1 %585 }
 0x437   : > { %1255 = vrot.lane.b32.xlu0 %v2420_v57, %s2092_s19 }
 0x439   : > { %v562_v8 = vpop.permute.xlu0 %561  ;;  %v791_v14 = vpop.permute.xlu1 %790 }
 0x43a   : > { %v588_v20 = vsel %vm438_vm3, %v2398_v55, %v562_v8  ;;  %v807_v54 = vsel %vm442_vm5, %v806_v50, %v791_v14 }
 0x43b   : > { %1362 = vrot.lane.b32.xlu0 %v2409_v56, %s2091_s22 }
 0x43d   : > { %v566_v10 = vpop.permute.xlu0 %565  ;;  %v693_v17 = vpop.permute.xlu1 %692 }
 0x43e   : > { %v589_v22 = vsel %vm440_vm4, %v588_v20, %v566_v10 }
 0x43f   : > { %1378 = vrot.lane.b32.xlu0 %v2332_v4, %s2088_s8  ;;  %s2095_s8 = smov [#allocation8]  }
 0x440   : > { %s2008_s16 = sshll.u32 %s2095_s8, 4  ;;  %s2009_s16 = int_to_ptr.vmem [resolvable:$false] %s2008_s16 }
 0x441   : > { %v570_v11 = vpop.permute.xlu0 %569  ;;  %v794_v19 = vpop.permute.xlu1 %793  ;;  %s2010_s17 = scalar_lea.vmem %s2009_s16, 512  ;;  %p2011_p2 = scmp.lt.s32.totalorder %s2669_s20, %s2009_s16 }
 0x442   : > { %v590_v23 = vsel %vm442_vm5, %v589_v22, %v570_v11  ;;  %v808_v56 = vsel %vm444_vm6, %v807_v54, %v794_v19  ;;  %p2012_p0 = scmp.lt.s32.totalorder %s2010_s17, %s2004_s28 }
 0x444   : > { %p2013_p9 = por %p2012_p0, %p2011_p2 }
 0x445   : > { %v678_v13 = vpop.permute.xlu0 %677  ;;  %v797_v27 = vpop.permute.xlu1 %796 }
 0x446   : > { %v696_v34 = vsel %vm440_vm4, %v695_v32, %v678_v13  ;;  %p2014_p6 = pnand %p2013_p9, %p2007_p10 }
 0x449   : > { %v574_v15 = vpop.permute.xlu0 %573  ;;  %v1021_v31 = vpop.permute.xlu1 %1020 }
 0x44a   : > { %v591_v24 = vsel %vm444_vm6, %v590_v23, %v574_v15  ;;  %v1041_v19 = vsel %vm438_vm3, %v2451_v62, %v1021_v31 }
 0x44d   : > { %v681_v16 = vpop.permute.xlu0 %680  ;;  %v907_v39 = vpop.permute.xlu1 %906 }
 0x44e   : > { %v697_v35 = vsel %vm442_vm5, %v696_v34, %v681_v16 }
 0x451   : > { %v578_v18 = vpop.permute.xlu0 %577  ;;  %v1128_v44 = vpop.permute.xlu1 %1127 }
 0x452   : > { %v592_v25 = vsel %vm446_vm7, %v591_v24, %v578_v18 }
 0x455   : > { %v684_v21 = vpop.permute.xlu0 %683 }
 0x456   : > { %v698_v36 = vsel %vm444_vm6, %v697_v35, %v684_v21 }
 0x459   : > { %v582_v26 = vpop.permute.xlu0 %581 }
 0x45a   : > { %v593_v28 = vsel %vm448_vm8, %v592_v25, %v582_v26  ;;  %v1148_v26 = vsel %vm438_vm3, %v2437_v60, %v1128_v44 }
 0x45b   : > { %v2551_v29 = vsel %vm450_vm9, %v593_v28, %v586_v12 }
 0x45c   : > { %1752 = vmatmul.mubr.msk.f32.vlgmr.msra.gmra.mrb[2].mxu1 %vm467_vm10, %v2551_v29 }
 0x45d   : > { %1760 = vmatpush3.msra.mxu1 %v2391_v48  ;;  %v687_v30 = vpop.permute.xlu0 %686  ;;  %1761 = vmatprep.mubr.msk.f32.mxu1 %vm2082_vm0, %v2083_v1  ;;  %v1027_v48 = vpop.permute.xlu1 %1026 }
 0x45e   : > { %1769 = vmatprep.subr.mxu1 %v2083_v1  ;;  %v699_v37 = vsel %vm446_vm7, %v698_v36, %v687_v30 }
 0x461   : > { %v895_v33 = vpop.permute.xlu0 %894  ;;  %v913_v0 = vpop.permute.xlu1 %912 }
 0x462   : > { %v915_v52 = vsel %vm438_vm3, %v2448_v61, %v895_v33 }
 0x465   : > { %v690_v38 = vpop.permute.xlu0 %689 }
 0x466   : > { %v700_v40 = vsel %vm448_vm8, %v699_v37, %v690_v38 }
 0x467   : > { %v701_v41 = vsel %vm450_vm9, %v700_v40, %v693_v17 }
 0x468   : > { %1757 = vmatmul.mubr.msk.f32.vlgmr.msra.gmra.mrb[2].mxu0 %vm467_vm10, %v701_v41  ;;  %v702_v42 = vsel %vm467_vm10, %v701_v41, 0.0 }
 0x469   : > { %1765 = vmatpush3.msra.mxu0 %v926_v63  ;;  %703 = vadd.xlane.f32.xlu1 %v702_v42  ;;  %v898_v43 = vpop.permute.xlu0 %897  ;;  %v809_v63 = vsel %vm446_vm7, %v808_v56, %v797_v27 }
 0x46a   : > { %1766 = vmatprep.mubr.msk.f32.mxu0 %vm2082_vm0, %v2083_v1  ;;  %1774 = vmatprep.subr.mxu0 %v2083_v1  ;;  %v916_v55 = vsel %vm440_vm4, %v915_v52, %v898_v43 }
 0x46b   : > { %v917_v8 = vsel %vm442_vm5, %v916_v55, %v2529_v5  ;;  %v1033_v5 = vpop.permute.xlu1 %1032 }
 0x46d   : > { %v904_v45 = vpop.permute.xlu0 %903 }
 0x46e   : > { %v918_v2 = vsel %vm444_vm6, %v917_v8, %v904_v45 }
 0x46f   : > { %v919_v11 = vsel %vm446_vm7, %v918_v2, %v907_v39  ;;  %v1238_v16 = vpop.permute.xlu1 %1237 }
 0x470   : > { %v1258_v40 = vsel %vm438_vm3, %v2430_v59, %v1238_v16 }
 0x471   : > { %v800_v46 = vpop.permute.xlu0 %799 }
 0x472   : > { %v810_v58 = vsel %vm448_vm8, %v809_v63, %v800_v46  ;;  %v595_v63 = vsel %vm467_vm10, %v2551_v29, 0.0 }
 0x473   : > { %v1348_v20 = vpop.permute.xlu1 %1347 }
 0x474   : > { %v1368_v47 = vsel %vm438_vm3, %v2420_v57, %v1348_v20 }
 0x475   : > { %v1024_v53 = vpop.permute.xlu0 %1023 }
 0x476   : > { %v1042_v21 = vsel %vm440_vm4, %v1041_v19, %v1024_v53 }
 0x477   : > { %v1043_v23 = vsel %vm442_vm5, %v1042_v21, %v1027_v48 }
 0x478   : > { %v1044_v24 = vsel %vm444_vm6, %v1043_v23, %v2527_v3 }
 0x479   : > { %v803_v9 = vpop.permute.xlu0 %802  ;;  %v1045_v27 = vsel %vm446_vm7, %v1044_v24, %v1033_v5 }
 0x47a   : > { %v811_v61 = vsel %vm450_vm9, %v810_v58, %v803_v9 }
 0x47b   : > { %1762 = vmatmul.mubr.msk.f32.vlgmr.msra.gmra.mrb[4].mxu1 %vm467_vm10, %v811_v61  ;;  %v812_v10 = vsel %vm467_vm10, %v811_v61, 0.0 }
 0x47c   : > { %813 = vadd.xlane.f32.xlu0 %v812_v10  ;;  %1770 = vmatpush3.msra.mxu1 %v2332_v4 }
 0x47d   : > { %v910_v12 = vpop.permute.xlu0 %909  ;;  %1771 = vmatprep.mubr.msk.f32.mxu1 %vm2082_vm0, %v2083_v1  ;;  %1779 = vmatprep.subr.mxu1 %v2083_v1 }
 0x47e   : > { %v920_v13 = vsel %vm448_vm8, %v919_v11, %v910_v12 }
 0x47f   : > { %v921_v14 = vsel %vm450_vm9, %v920_v13, %v913_v0 }
 0x480   : > { %1767 = vmatmul.mubr.msk.f32.vlgmr.msra.gmra.mrb[4].mxu0 %vm467_vm10, %v921_v14  ;;  %v922_v15 = vsel %vm467_vm10, %v921_v14, 0.0 }
 0x481   : > { %1775 = vmatpush3.msra.mxu0 %v2393_v49  ;;  %923 = vadd.xlane.f32.xlu1 %v922_v15  ;;  %v1131_v4 = vpop.permute.xlu0 %1130  ;;  %v1143_v49 = vpop.permute.xlu1 %1142 }
 0x482   : > { %1776 = vmatprep.mubr.msk.f32.mxu0 %vm2082_vm0, %v2083_v1  ;;  %1784 = vmatprep.subr.mxu0 %v2083_v1  ;;  %v1149_v28 = vsel %vm440_vm4, %v1148_v26, %v1131_v4 }
 0x485   : > { %v1134_v17 = vpop.permute.xlu0 %1133  ;;  %v1351_v31 = vpop.permute.xlu1 %1350 }
 0x486   : > { %v1150_v32 = vsel %vm442_vm5, %v1149_v28, %v1134_v17  ;;  %v1369_v59 = vsel %vm440_vm4, %v1368_v47, %v1351_v31 }
 0x489   : > { %v1137_v18 = vpop.permute.xlu0 %1136  ;;  %v1354_v35 = vpop.permute.xlu1 %1353 }
 0x48a   : > { %v1151_v34 = vsel %vm444_vm6, %v1150_v32, %v1137_v18  ;;  %v1370_v52 = vsel %vm442_vm5, %v1369_v59, %v1354_v35  ;;  %v1473_v32 = vld [vmem:[#allocation7 + $0x10] sm:$0xff] }
 0x48b   : > { %v1152_v3 = vsel %vm446_vm7, %v1151_v34, %v2535_v7 }
 0x48c   : > { %v1153_v36 = vsel %vm448_vm8, %v1152_v3, %v1143_v49 }
 0x48d   : > { %v1036_v22 = vpop.permute.xlu0 %1035  ;;  %v1357_v41 = vpop.permute.xlu1 %1356 }
 0x48e   : > { %v1046_v62 = vsel %vm448_vm8, %v1045_v27, %v1036_v22  ;;  %v1371_v54 = vsel %vm444_vm6, %v1370_v52, %v1357_v41 }
 0x491   : > { %v1241_v25 = vpop.permute.xlu0 %1240  ;;  %v1360_v46 = vpop.permute.xlu1 %1359 }
 0x492   : > { %v1259_v7 = vsel %vm440_vm4, %v1258_v40, %v1241_v25  ;;  %v1372_v55 = vsel %vm446_vm7, %v1371_v54, %v1360_v46 }
 0x495   : > { %v1039_v30 = vpop.permute.xlu0 %1038  ;;  %v1366_v56 = vpop.permute.xlu1 %1365 }
 0x496   : > { %v1047_v33 = vsel %vm450_vm9, %v1046_v62, %v1039_v30  ;;  %v1471_v62 = vld [vmem:[#allocation7] sm:$0xff]  ;;  %v1472_v30 = vld [vmem:[#allocation7 + $0x8] sm:$0xff] }
 0x497   : > { %1772 = vmatmul.mubr.msk.f32.vlgmr.msra.gmra.mrb[6].mxu1 %vm467_vm10, %v1047_v33  ;;  %v1048_v9 = vsel %vm467_vm10, %v1047_v33, 0.0  ;;  %v1807_v31 = vpack.c.bf16 %v1472_v30, %v1471_v62  ;;  %v1474_v33 = vld [vmem:[#allocation7 + $0x18] sm:$0xff] }
 0x498   : > { %1780 = vmatpush3.msra.mxu1 %v2396_v51  ;;  %1781 = vmatprep.mubr.msk.f32.mxu1 %vm2082_vm0, %v2083_v1  ;;  %v1811_v34 = vpack.c.bf16 %v1474_v33, %v1473_v32 }
 0x499   : > { %v1244_v60 = vpop.permute.xlu0 %1243  ;;  %1808 = vmatprep.subr.bf16.mxu1 %v1807_v31 }
 0x49a   : > { %v1260_v42 = vsel %vm442_vm5, %v1259_v7, %v1244_v60 }
 0x49d   : > { %v1146_v37 = vpop.permute.xlu0 %1145 }
 0x49e   : > { %v1154_v38 = vsel %vm450_vm9, %v1153_v36, %v1146_v37 }
 0x49f   : > { %1777 = vmatmul.mubr.msk.f32.vlgmr.msra.gmra.mrb[6].mxu0 %vm467_vm10, %v1154_v38  ;;  %v1155_v39 = vsel %vm467_vm10, %v1154_v38, 0.0 }
 0x4a0   : > { %1156 = vadd.xlane.f32.xlu0 %v1155_v39  ;;  %1786 = vmatprep.mubr.msk.f32.mxu0 %vm2082_vm0, %v2083_v1 }
 0x4a1   : > { %v1247_v51 = vpop.permute.xlu0 %1246 }
 0x4a2   : > { %v1261_v43 = vsel %vm444_vm6, %v1260_v42, %v1247_v51 }
 0x4a5   : > { %v1250_v44 = vpop.permute.xlu0 %1249 }
 0x4a6   : > { %v1262_v45 = vsel %vm446_vm7, %v1261_v43, %v1250_v44 }
 0x4a7   : > { %v1263_v1 = vsel %vm448_vm8, %v1262_v45, %v2533_v6 }
 0x4a9   : > { %v1256_v48 = vpop.permute.xlu0 %1255 }
 0x4aa   : > { %v1264_v50 = vsel %vm450_vm9, %v1263_v1, %v1256_v48 }
 0x4ab   : > { %1782 = vmatmul.mubr.msk.f32.vlgmr.msra.gmra.mrb[8].mxu1 %vm467_vm10, %v1264_v50  ;;  %v1265_v53 = vsel %vm467_vm10, %v1264_v50, 0.0 }
 0x4ac   : > { %1266 = vadd.xlane.f32.xlu0 %v1265_v53  ;;  %1810 = vmatpush3.bf16.msra.mxu1 %v1807_v31 }
 0x4ad   : > { %v1363_v57 = vpop.permute.xlu0 %1362  ;;  %1812 = vmatprep.subr.bf16.mxu1 %v1811_v34 }
 0x4ae   : > { %v1373_v6 = vsel %vm448_vm8, %v1372_v55, %v1363_v57 }
 0x4af   : > { %v1374_v0 = vsel %vm450_vm9, %v1373_v6, %v1366_v56  ;;  %v1697_v6 = vld [vmem:[%s2727_s6] ss:$0 sm:$0xff] }
 0x4b0   : > { %596 = vadd.xlane.f32.xlu0 %v595_v63  ;;  %v1375_v8 = vsel %vm467_vm10, %v1374_v0, 0.0  ;;  %1814 = vmatpush3.bf16.msra.mxu1 %v1811_v34 }
 0x4b1   : > { %1376 = vadd.xlane.f32.xlu1 %v1375_v8  ;;  %v1379_v58 = vpop.permute.xlu0 %1378 }
 0x4b2   : > { %1785 = vmatpush3.msra.mxu0 %v1379_v58 }
 0x4b3   : > { %1787 = vmatmul.mubr.msk.f32.vlgmr.msra.gmra.mrb[8].mxu0 %vm467_vm10, %v1374_v0 }
 0x4b5   : > { %1049 = vadd.xlane.f32.xlu1 %v1048_v9 }
 0x4f6   : > { %v704_v2 = vpop.xlane.xlu1 %703 }
 0x4f7   : > { %1902 = vrcp.f32 %v704_v2 }
 0x501   : > { %v1903_v11 = vpop.eup %1902 }
 0x509   : > { %v814_v13 = vpop.xlane.xlu0 %813 }
 0x50a   : > { %1904 = vrcp.f32 %v814_v13 }
 0x50e   : > { %v924_v14 = vpop.xlane.xlu1 %923 }
 0x50f   : > { %1906 = vrcp.f32 %v924_v14 }
 0x514   : > { %v1905_v15 = vpop.eup %1904 }
 0x519   : > { %v1907_v18 = vpop.eup %1906 }
 0x52d   : > { %v1157_v22 = vpop.xlane.xlu0 %1156 }
 0x52e   : > { %1908 = vrcp.f32 %v1157_v22 }
 0x52f   : > { %v667_v61 = vpop.f32.mrb[2].mxu1 }
 0x530   : > { %v1753_v10 = vpop.f32.mrb[3].mxu1 }
 0x538   : > { %v1909_v25 = vpop.eup %1908 }
 0x539   : > { %v1267_v24 = vpop.xlane.xlu0 %1266 }
 0x53a   : > { %1910 = vrcp.f32 %v1267_v24 }
 0x53b   : > { %v777_v12 = vpop.f32.mrb[2].mxu0 }
 0x53c   : > { %v782_v29 = vmul.f32 %v1903_v11, %v777_v12  ;;  %v1758_v5 = vpop.f32.mrb[3].mxu0 }
 0x53d   : > { %v597_v41 = vpop.xlane.xlu0 %596 }
 0x53e   : > { %1004 = vrot.lane.b32.xlu0 %v782_v29, %s2087_s9  ;;  %v1377_v60 = vpop.xlane.xlu1 %1376 }
 0x53f   : > { %1912 = vrcp.f32 %v1377_v60 }
 0x540   : > { %1914 = vrcp.f32 %v597_v41 }
 0x542   : > { %v1050_v7 = vpop.xlane.xlu1 %1049 }
 0x543   : > { %1916 = vrcp.f32 %v1050_v7 }
 0x544   : > { %v1911_v3 = vpop.eup %1910 }
 0x549   : > { %v1913_v38 = vpop.eup %1912 }
 0x54a   : > { %v1915_v42 = vpop.eup %1914 }
 0x54b   : > { %v672_v44 = vmul.f32 %v1915_v42, %v667_v61 }
 0x54d   : > { %v1917_v50 = vpop.eup %1916 }
 0x54e   : > { %v887_v4 = vpop.f32.mrb[4].mxu1 }
 0x54f   : > { %v892_v16 = vmul.f32 %v1905_v15, %v887_v4  ;;  %v1763_v17 = vpop.f32.mrb[5].mxu1 }
 0x551   : > { %1008 = vrot.lane.b32.xlu1 %v892_v16, %s2093_s1 }
 0x553   : > { %v997_v19 = vpop.f32.mrb[4].mxu0 }
 0x554   : > { %v1002_v20 = vmul.f32 %v1907_v18, %v997_v19  ;;  %v1768_v21 = vpop.f32.mrb[5].mxu0 }
 0x556   : > { %1012 = vrot.lane.b32.xlu0 %v1002_v20, %s2094_s12 }
 0x56a   : > { %v1120_v23 = vpop.f32.mrb[6].mxu1 }
 0x56b   : > { %v1773_v49 = vpop.f32.mrb[7].mxu1  ;;  %v1125_v52 = vmul.f32 %v1917_v50, %v1120_v23 }
 0x572   : > { %v1230_v26 = vpop.f32.mrb[6].mxu0 }
 0x573   : > { %v1235_v27 = vmul.f32 %v1909_v25, %v1230_v26  ;;  %v1778_v28 = vpop.f32.mrb[7].mxu0 }
 0x575   : > { %1457 = vrot.lane.b32.xlu1 %v1235_v27, %s2087_s9 }
 0x57e   : > { %v1340_v35 = vpop.f32.mrb[8].mxu1 }
 0x57f   : > { %v1345_v36 = vmul.f32 %v1911_v3, %v1340_v35  ;;  %v1783_v37 = vpop.f32.mrb[9].mxu1 }
 0x581   : > { %1461 = vrot.lane.b32.xlu1 %v1345_v36, %s2093_s1 }
 0x586   : > { %v1450_v39 = vpop.f32.mrb[8].mxu0 }
 0x587   : > { %v1455_v51 = vmul.f32 %v1913_v38, %v1450_v39  ;;  %v1788_v40 = vpop.f32.mrb[9].mxu0 }
 0x589   : > { %1465 = vrot.lane.b32.xlu0 %v1455_v51, %s2094_s12 }
 0x5b0   : > { %v1005_v43 = vpop.permute.xlu0 %1004 }
 0x5b1   : > { %v1015_v46 = vsel %vm467_vm10, %v672_v44, %v1005_v43 }
 0x5c3   : > { %v1009_v45 = vpop.permute.xlu1 %1008 }
 0x5c4   : > { %v1016_v47 = vsel %vm478_vm11, %v1015_v46, %v1009_v45 }
 0x5c8   : > { %v1013_v1 = vpop.permute.xlu0 %1012 }
 0x5c9   : > { %v1018_v48 = vsel %vm1017_vm13, %v1016_v47, %v1013_v1 }
 0x5ca   : > { %1797 = vmatprep.mubr.msk.f32.mxu1 %vm335_vm1, %v1018_v48 }
 0x5e7   : > { %v1458_v59 = vpop.permute.xlu1 %1457 }
 0x5e8   : > { %v1468_v54 = vsel %vm467_vm10, %v1125_v52, %v1458_v59 }
 0x5f3   : > { %v1462_v53 = vpop.permute.xlu1 %1461 }
 0x5f4   : > { %v1469_v55 = vsel %vm478_vm11, %v1468_v54, %v1462_v53 }
 0x5fb   : > { %v1466_v57 = vpop.permute.xlu0 %1465 }
 0x5fc   : > { %v1470_v56 = vsel %vm1017_vm13, %v1469_v55, %v1466_v57 }
 0x5fd   : > { %1798 = vmatmul.mubr.msk.f32.vlgmr.msra.gmra.mrb[10].mxu1 %vm335_vm1, %v1470_v56 }
 0x6d0   : > { %v1799_v63 = vpop.f32.mrb[10].mxu1 }
 0x6d1   : > { %v1560_v0 = vadd.f32 %v1799_v63, %v1697_v6  ;;  %v1554_v8 = vpop.f32.mrb[11].mxu1 }
 0x6d2   : > { %v1555_v58 = vadd.f32 %v1697_v6, %v1554_v8 }
 0x6d3   : > { %1564 = vst.msk [vmem:[%s323_s10 + $0x8] sm:$0xff] %vm335_vm1, %v1560_v0 }
 0x6d4   : > { %1563 = vst.msk [vmem:[%s323_s10] sm:$0xff] %vm335_vm1, %v1555_v58 }
 0x6d5   : > { %2017 = shalt.err (!%p2014_p6)
}
 0x6d6   : > { %s2018_s22 = scalar_lea.hbm %s2674_s29, 256  ;;  %s2022_s12 = scalar_lea.hbm %s2728_s7, 512 }
 0x6d7   : > { %p2019_p12 = scmp.ne.s32.totalorder %s2674_s29, %s2018_s22  ;;  %p2023_p11 = scmp.lt.u32.totalorder %s2674_s29, %s2728_s7 }
 0x6d8   : > { %p2024_p7 = scmp.lt.u32.totalorder %s2022_s12, %s2018_s22  ;;  %p2026_p8 = scmp.lt.u32.totalorder %s2018_s22, %s2674_s29 }
 0x6d9   : > { %p2020_p13 = pnand %p2019_p12, %p2755_p4 }
 0x6da   : > { %p2025_p3 = por %p2024_p7, %p2023_p11 }
 0x6db   : > { %p2021_p1 = pneg %p2020_p13 }
 0x6dc   : > { %p2027_p5 = por %p2026_p8, %p2025_p3 }
 0x6de   : > { %p2028_p10 = pnand %p2027_p5, %p2021_p1 }
 0x6e0   : > { %2031 = shalt.err (!%p2028_p10)
}
 0x6e1   : > { %s2096_s10 = smov 128  }
 0x6e2   : > { %1825 = dma.vmem_to_hbm [thread:$0]  (%p2755_p4), %s2669_s20, 256, %s2674_s29, %s1566_s21, %s2096_s10, %s2096_s10, %s2087_s9  }
 0x6e3 PF: > { %s1594_s18 = sand.u32 1, %s2062_s24   ;;  %p2756_p2 = scmp.ne.s32.totalorder %s2744_s14, 0 }
 0x6e4   : > { %p2757_p0 = scmp.ge.s32.totalorder %s2074_s27, 2  ;;  %s1595_s23 = scalar_lea.sflag [#allocation4], %s1594_s18 }
 0x6e6   : > { %p1839_p9 = pnand %p2757_p0, %p2756_p2 }
 0x6e8   : > { %2057 = dma.done.wait (!%p1839_p9), %s1595_s23, 256  }
 0x6e9   : > { %2059 = vsyncadd (!%p1839_p9), %s1595_s23, 4294967040  ;;  %s2758_s27 = sld [smem:[#allocation13_spill]]  ;;  %s2759_s13 = sld [smem:[#allocation12_spill]] }
 0x6ea   : > { %s2760_s26 = sld [smem:[#allocation14_spill]]  ;;  %s2761_s24 = smov %s2066_s25 }
 0x6ef   : > { %p21_p6 = scmp.ge.s32.totalorder %s2758_s27, 4   ;;  %s2762_s25 = smov %s2759_s13 }
 0x6f1   :  { %23 = sbr.rel (!%p21_p6) target bundleno = 8 (0x8), region = 101 }
 0x6f8   :  { %1600 = vsyncpa [#allocation3], 1 }
 0x6f9   :  { %1602 = vsyncpa [#allocation3 + $0x1], 1 }
 0x6fa   :  { %1603 = vsyncpa [#allocation6], 1 }
 0x6fb   :  { %1604 = vsyncpa [#allocation4], 1 }
 0x6fc   :  { %1606 = vsyncpa [#allocation4 + $0x1], 1 }

</bundles_post_ra>
